<compile_context>
chip_gen: v7x
topology: tpu7x:2x2x1
jax: 0.10.0
libtpu: 0.0.40
codegen_flags: <defaults>
</compile_context>

<pallas_src>
import functools

import jax
import jax.numpy as jnp
import numpy as np
from jax.experimental import pallas as pl
from jax.experimental.pallas import tpu as pltpu

LEAKY_SLOPE = 0.01
EPS = 1e-4
HIGHEST = jax.lax.Precision.HIGHEST

# Row indices inside the single packed (14, W) parameter stack.
(_B1, _LN1G, _LN1B, _BN1G, _BN1B, _BO,
 _B2, _LN2G, _LN2B, _BN2G, _BN2B,
 _BQKV, _B3, _BMV) = range(14)


# ----------------------------- shared math ---------------------------------
def _layernorm(h, g, b):
    mu = jnp.mean(h, axis=-1, keepdims=True)
    var = jnp.mean((h - mu) ** 2, axis=-1, keepdims=True)
    return (h - mu) * jax.lax.rsqrt(var + EPS) * g + b


def _batchnorm(h, g, b):
    # training-mode BatchNorm1d: biased batch statistics over axis 0
    mu = jnp.mean(h, axis=0, keepdims=True)
    var = jnp.mean((h - mu) ** 2, axis=0, keepdims=True)
    return (h - mu) * jax.lax.rsqrt(var + EPS) * g + b


def _leaky(h):
    return jnp.where(h >= 0, h, LEAKY_SLOPE * h)


# ------------------------------- kernel -------------------------------------
def encoder_atac_kernel(
    x_ref, w1_ref, wqkv_ref, wo_ref, w2_ref, w3_ref, wmv_ref, vecs_ref,
    out_ref,
    head_cat_ref,                      # (N, E) f32 VMEM scratch
    *, num_heads, embed_dim, n_hidden, n_latent,
):
    f32 = jnp.float32
    mm = functools.partial(jnp.dot, preferred_element_type=f32,
                           precision=HIGHEST)

    x = x_ref[...]
    v = vecs_ref[...]                  # (14, 3E) f32 packed small params

    def prow(i, width):                # one (1, width) parameter row
        return v[i:i + 1, :width]

    # ---- MLP1 ----
    h = mm(x, w1_ref[...]) + prow(_B1, embed_dim)
    h = _layernorm(h, prow(_LN1G, embed_dim), prow(_LN1B, embed_dim))
    h = _batchnorm(h, prow(_BN1G, embed_dim), prow(_BN1B, embed_dim))
    h = _leaky(h)
    # TODO(synk): Dropout(p=0.1) left as identity (cannot match torch RNG);
    # matches eval-mode dropout behaviour.

    # ---- MultiheadAttention (self-attention, unbatched (L, E)) ----
    # Fused QKV projection; columns pre-ordered per head: [q_h | k_h | v_h].
    qkv = mm(h, wqkv_ref[...]) + prow(_BQKV, 3 * embed_dim)   # (N, 3E) f32
    dh = embed_dim // num_heads
    scale = 1.0 / np.sqrt(float(dh))

    # Static unroll: num_heads is small and N is tiny here.  At large N,
    # convert to lax.fori_loop so only one (N, N) f32 temporary stays live.
    for hd in range(num_heads):
        base = hd * 3 * dh             # contiguous per-head [q|k|v] window
        qh = qkv[:, base:base + dh]
        kh = qkv[:, base + dh:base + 2 * dh]
        vh = qkv[:, base + 2 * dh:base + 3 * dh]
        s = mm(qh, kh.T) * scale                       # (N, N) f32
        s = s - jnp.max(s, axis=-1, keepdims=True)
        probs = jnp.exp(s)
        probs = probs / jnp.sum(probs, axis=-1, keepdims=True)
        # write this head's output at its static column offset; the output
        # projection is then ONE K=embed_dim matmul instead of num_heads
        # K=dh matmuls.
        head_cat_ref[:, hd * dh:(hd + 1) * dh] = mm(probs, vh)

    attn = mm(head_cat_ref[...], wo_ref[...]) + prow(_BO, embed_dim)

    # ---- MLP2 ----
    h2 = mm(attn, w2_ref[...]) + prow(_B2, n_hidden)
    h2 = _layernorm(h2, prow(_LN2G, n_hidden), prow(_LN2B, n_hidden))
    h2 = _batchnorm(h2, prow(_BN2G, n_hidden), prow(_BN2B, n_hidden))
    h2 = _leaky(h2)
    # (second Dropout also identity)
    z = _leaky(mm(h2, w3_ref[...]) + prow(_B3, n_latent))     # (N, n_latent)

    # ---- fused mean / var encoders ----
    mv = mm(z, wmv_ref[...]) + prow(_BMV, 2 * n_latent)       # (N, 2*n_latent)

    # Direct slice stores into the single output slab [ z | mean | var ]
    # (no in-kernel concatenate / relayout copy).
    out_ref[:, :n_latent] = z
    out_ref[:, n_latent:] = mv


# ------------------------------- wrapper -------------------------------------
def encoder_atac(x, p, *, num_heads):
    n = x.shape[0]
    embed_dim = p["w1"].shape[1]
    n_hidden = p["w2"].shape[1]
    n_latent = p["w3"].shape[1]
    dh = embed_dim // num_heads

    # Fused QKV projection with per-head contiguous [q_h | k_h | v_h] windows.
    def head_block(w_or_b, h):
        return w_or_b[:, h * dh:(h + 1) * dh]
    wqkv = jnp.concatenate(
        [jnp.concatenate([head_block(p["wq"], h),
                          head_block(p["wk"], h),
                          head_block(p["wv"], h)], axis=1)
         for h in range(num_heads)], axis=1)                 # (E, 3E)
    bqkv = jnp.concatenate(
        [jnp.concatenate([head_block(p["bq"], h),
                          head_block(p["bk"], h),
                          head_block(p["bv"], h)], axis=1)
         for h in range(num_heads)], axis=1)                 # (1, 3E)

    # Fused mean/var encoders.
    wmv = jnp.concatenate([p["wm"], p["wvar"]], axis=1)      # (L, 2L)
    bmv = jnp.concatenate([p["bm"], p["bvar"]], axis=1)      # (1, 2L)

    # Single packed (14, W) stack for every small (1, width) parameter row,
    # zero-padded to a common lane width -> one input instead of five.
    width = max(3 * embed_dim, n_hidden, 2 * n_latent)

    def pad(row):
        return jnp.pad(row, ((0, 0), (0, width - row.shape[1])))

    vecs = jnp.concatenate([pad(r) for r in (
        p["b1"], p["ln1g"], p["ln1b"], p["bn1g"], p["bn1b"], p["bo"],
        p["b2"], p["ln2g"], p["ln2b"], p["bn2g"], p["bn2b"],
        bqkv, p["b3"], bmv)], axis=0)                        # (14, W) f32

    args = (x, p["w1"], wqkv, p["wo"], p["w2"], p["w3"], wmv, vecs)
    vmem = pl.BlockSpec(memory_space=pltpu.MemorySpace.VMEM)
    out = pl.pallas_call(
        functools.partial(encoder_atac_kernel, num_heads=num_heads,
                          embed_dim=embed_dim, n_hidden=n_hidden,
                          n_latent=n_latent),
        out_shape=jax.ShapeDtypeStruct((n, 3 * n_latent), jnp.float32),
        in_specs=[vmem] * len(args),
        out_specs=vmem,
        scratch_shapes=[pltpu.VMEM((n, embed_dim), jnp.float32)],
        # Single grid point: BatchNorm batch stats and the NxN self-attention
        # couple all rows, so one logical batch cannot be tiled over N.
        # 32 MiB scoped VMEM is safe on v5e/v6e (128 MiB) and v7x (64 MiB).
        compiler_params=pltpu.CompilerParams(vmem_limit_bytes=32 * 1024 * 1024),
    )(*args)

    z = out[:, :n_latent]
    mean = out[:, n_latent:2 * n_latent]
    var = out[:, 2 * n_latent:]
    return z, mean, var


# --------------------------- pure-JAX reference ------------------------------
def encoder_atac_ref(x, p, *, num_heads):
    dot = functools.partial(jnp.dot, precision=HIGHEST)
    h = dot(x, p["w1"]) + p["b1"]
    h = _layernorm(h, p["ln1g"], p["ln1b"])
    h = _batchnorm(h, p["bn1g"], p["bn1b"])
    h = _leaky(h)

    q = dot(h, p["wq"]) + p["bq"]
    k = dot(h, p["wk"]) + p["bk"]
    v = dot(h, p["wv"]) + p["bv"]
    e = q.shape[-1]
    dh = e // num_heads
    outs = []
    for hd in range(num_heads):
        qh, kh, vh = (a[:, hd * dh:(hd + 1) * dh] for a in (q, k, v))
        s = dot(qh, kh.T) / np.sqrt(float(dh))
        pw = jax.nn.softmax(s, axis=-1)
        outs.append(dot(pw, vh))
    attn = dot(jnp.concatenate(outs, axis=-1), p["wo"]) + p["bo"]

    h2 = dot(attn, p["w2"]) + p["b2"]
    h2 = _layernorm(h2, p["ln2g"], p["ln2b"])
    h2 = _batchnorm(h2, p["bn2g"], p["bn2b"])
    h2 = _leaky(h2)
    z = _leaky(dot(h2, p["w3"]) + p["b3"])
    return z, dot(z, p["wm"]) + p["bm"], dot(z, p["wvar"]) + p["bvar"]


# ------------------------------- param init ----------------------------------
def init_params(key, input_dim, embed_dim, n_hidden, n_latent):
    def lin(k, fan_in, fan_out):
        kw, kb = jax.random.split(k)
        s = 1.0 / np.sqrt(fan_in)
        w = jax.random.uniform(kw, (fan_in, fan_out), jnp.float32, -s, s)
        b = jax.random.uniform(kb, (1, fan_out), jnp.float32, -s, s)
        return w, b

    def norm(k, d):
        kg, kb = jax.random.split(k)
        g = 1.0 + 0.1 * jax.random.normal(kg, (1, d), jnp.float32)
        b = 0.1 * jax.random.normal(kb, (1, d), jnp.float32)
        return g, b

    keys = jax.random.split(key, 16)
    p = {}
    p["w1"], p["b1"] = lin(keys[0], input_dim, embed_dim)
    p["ln1g"], p["ln1b"] = norm(keys[1], embed_dim)
    p["bn1g"], p["bn1b"] = norm(keys[2], embed_dim)
    p["wq"], p["bq"] = lin(keys[3], embed_dim, embed_dim)
    p["wk"], p["bk"] = lin(keys[4], embed_dim, embed_dim)
    p["wv"], p["bv"] = lin(keys[5], embed_dim, embed_dim)
    p["wo"], p["bo"] = lin(keys[6], embed_dim, embed_dim)
    p["w2"], p["b2"] = lin(keys[7], embed_dim, n_hidden)
    p["ln2g"], p["ln2b"] = norm(keys[8], n_hidden)
    p["bn2g"], p["bn2b"] = norm(keys[9], n_hidden)
    p["w3"], p["b3"] = lin(keys[10], n_hidden, n_latent)
    p["wm"], p["bm"] = lin(keys[11], n_latent, n_latent)
    p["wvar"], p["bvar"] = lin(keys[12], n_latent, n_latent)
    return p


# ---------------------------------- main --------------------------------------
if __name__ == "__main__":
    # Small demo shapes.  In production, batch >= 128 cells per call (M is the
    # only free MXU dimension); only *independent* problems may additionally be
    # batched via a leading "parallel" grid axis (v7x second TensorCore).
    N, INPUT_DIM = 8, 32
    EMBED_DIM, NUM_HEADS = 64, 4
    N_HIDDEN, N_LATENT = 32, 16

    key = jax.random.PRNGKey(0)
    kx, kp = jax.random.split(key)
    x = jax.random.normal(kx, (N, INPUT_DIM), jnp.float32)
    params = init_params(kp, INPUT_DIM, EMBED_DIM, N_HIDDEN, N_LATENT)

    out, mean, var = jax.block_until_ready(
        encoder_atac(x, params, num_heads=NUM_HEADS)
    )

    ref_out, ref_mean, ref_var = encoder_atac_ref(x, params, num_heads=NUM_HEADS)
    np.testing.assert_allclose(out, ref_out, rtol=1e-3, atol=1e-3)
    np.testing.assert_allclose(mean, ref_mean, rtol=1e-3, atol=1e-3)
    np.testing.assert_allclose(var, ref_var, rtol=1e-3, atol=1e-3)

    assert out.shape == (N, N_LATENT)
    assert mean.shape == (N, N_LATENT) and var.shape == (N, N_LATENT)
    print("KERNEL_OK")
</pallas_src>

<mosaic_0001>
module attributes {stable_mosaic.version = 11 : i64} {
  func.func @encoder_atac_kernel(%arg0: memref<8x32xf32, #tpu.memory_space<vmem>>, %arg1: memref<32x64xf32, #tpu.memory_space<vmem>>, %arg2: memref<64x192xf32, #tpu.memory_space<vmem>>, %arg3: memref<64x64xf32, #tpu.memory_space<vmem>>, %arg4: memref<64x32xf32, #tpu.memory_space<vmem>>, %arg5: memref<32x16xf32, #tpu.memory_space<vmem>>, %arg6: memref<16x32xf32, #tpu.memory_space<vmem>>, %arg7: memref<14x192xf32, #tpu.memory_space<vmem>>, %arg8: memref<8x48xf32, #tpu.memory_space<vmem>>, %arg9: memref<8x64xf32, #tpu.memory_space<vmem>>) attributes {dimension_semantics = [], scalar_prefetch = 0 : i64, scratch_operands = 1 : i64, tpu.core_type = #tpu.core_type<tc>} {
    %c0 = arith.constant 0 : index
    %c0_0 = arith.constant 0 : index
    %0 = vector.load %arg0[%c0, %c0_0] : memref<8x32xf32, #tpu.memory_space<vmem>>, vector<8x32xf32>
    %c0_1 = arith.constant 0 : index
    %c0_2 = arith.constant 0 : index
    %1 = vector.load %arg7[%c0_1, %c0_2] : memref<14x192xf32, #tpu.memory_space<vmem>>, vector<14x192xf32>
    %c0_3 = arith.constant 0 : index
    %c0_4 = arith.constant 0 : index
    %2 = vector.load %arg1[%c0_3, %c0_4] : memref<32x64xf32, #tpu.memory_space<vmem>>, vector<32x64xf32>
    %cst = arith.constant dense<0.000000e+00> : vector<8x64xf32>
    %3 = tpu.matmul %0, %2, %cst {dimension_numbers = #tpu.dot_dimension_numbers<[1], [0], [0], [1], [0, 0, 1, 1], [], []>, precision = #tpu.contract_precision<fp32>} : vector<8x32xf32>, vector<32x64xf32>, vector<8x64xf32> -> vector<8x64xf32>
    %4 = vector.extract_strided_slice %1 {offsets = [0, 0], sizes = [1, 64], strides = [1, 1]} : vector<14x192xf32> to vector<1x64xf32>
    %5 = vector.broadcast %4 : vector<1x64xf32> to vector<8x64xf32>
    %6 = arith.addf %3, %5 : vector<8x64xf32>
    %7 = vector.extract_strided_slice %1 {offsets = [1, 0], sizes = [1, 64], strides = [1, 1]} : vector<14x192xf32> to vector<1x64xf32>
    %8 = vector.extract_strided_slice %1 {offsets = [2, 0], sizes = [1, 64], strides = [1, 1]} : vector<14x192xf32> to vector<1x64xf32>
    %cst_5 = arith.constant dense<0.000000e+00> : vector<8xf32>
    %9 = vector.multi_reduction <add>, %6, %cst_5 [1] : vector<8x64xf32> to vector<8xf32>
    %10 = vector.shape_cast %9 : vector<8xf32> to vector<8x1xf32>
    %cst_6 = arith.constant 6.400000e+01 : f32
    %11 = vector.broadcast %cst_6 : f32 to vector<8x1xf32>
    %12 = arith.divf %10, %11 : vector<8x1xf32>
    %13 = vector.broadcast %12 : vector<8x1xf32> to vector<8x64xf32>
    %14 = arith.subf %6, %13 : vector<8x64xf32>
    %15 = arith.mulf %14, %14 : vector<8x64xf32>
    %cst_7 = arith.constant dense<0.000000e+00> : vector<8xf32>
    %16 = vector.multi_reduction <add>, %15, %cst_7 [1] : vector<8x64xf32> to vector<8xf32>
    %17 = vector.shape_cast %16 : vector<8xf32> to vector<8x1xf32>
    %cst_8 = arith.constant 6.400000e+01 : f32
    %18 = vector.broadcast %cst_8 : f32 to vector<8x1xf32>
    %19 = arith.divf %17, %18 : vector<8x1xf32>
    %20 = vector.broadcast %12 : vector<8x1xf32> to vector<8x64xf32>
    %21 = arith.subf %6, %20 : vector<8x64xf32>
    %cst_9 = arith.constant 9.99999974E-5 : f32
    %22 = vector.broadcast %cst_9 : f32 to vector<8x1xf32>
    %23 = arith.addf %19, %22 : vector<8x1xf32>
    %24 = math.rsqrt %23 : vector<8x1xf32>
    %25 = vector.broadcast %24 : vector<8x1xf32> to vector<8x64xf32>
    %26 = arith.mulf %21, %25 : vector<8x64xf32>
    %27 = vector.broadcast %7 : vector<1x64xf32> to vector<8x64xf32>
    %28 = arith.mulf %26, %27 : vector<8x64xf32>
    %29 = vector.broadcast %8 : vector<1x64xf32> to vector<8x64xf32>
    %30 = arith.addf %28, %29 : vector<8x64xf32>
    %31 = vector.extract_strided_slice %1 {offsets = [3, 0], sizes = [1, 64], strides = [1, 1]} : vector<14x192xf32> to vector<1x64xf32>
    %32 = vector.extract_strided_slice %1 {offsets = [4, 0], sizes = [1, 64], strides = [1, 1]} : vector<14x192xf32> to vector<1x64xf32>
    %cst_10 = arith.constant dense<0.000000e+00> : vector<64xf32>
    %33 = vector.multi_reduction <add>, %30, %cst_10 [0] : vector<8x64xf32> to vector<64xf32>
    %34 = vector.shape_cast %33 : vector<64xf32> to vector<1x64xf32>
    %cst_11 = arith.constant 8.000000e+00 : f32
    %35 = vector.broadcast %cst_11 : f32 to vector<1x64xf32>
    %36 = arith.divf %34, %35 : vector<1x64xf32>
    %37 = vector.broadcast %36 : vector<1x64xf32> to vector<8x64xf32>
    %38 = arith.subf %30, %37 : vector<8x64xf32>
    %39 = arith.mulf %38, %38 : vector<8x64xf32>
    %cst_12 = arith.constant dense<0.000000e+00> : vector<64xf32>
    %40 = vector.multi_reduction <add>, %39, %cst_12 [0] : vector<8x64xf32> to vector<64xf32>
    %41 = vector.shape_cast %40 : vector<64xf32> to vector<1x64xf32>
    %cst_13 = arith.constant 8.000000e+00 : f32
    %42 = vector.broadcast %cst_13 : f32 to vector<1x64xf32>
    %43 = arith.divf %41, %42 : vector<1x64xf32>
    %44 = vector.broadcast %36 : vector<1x64xf32> to vector<8x64xf32>
    %45 = arith.subf %30, %44 : vector<8x64xf32>
    %cst_14 = arith.constant 9.99999974E-5 : f32
    %46 = vector.broadcast %cst_14 : f32 to vector<1x64xf32>
    %47 = arith.addf %43, %46 : vector<1x64xf32>
    %48 = math.rsqrt %47 : vector<1x64xf32>
    %49 = vector.broadcast %48 : vector<1x64xf32> to vector<8x64xf32>
    %50 = arith.mulf %45, %49 : vector<8x64xf32>
    %51 = vector.broadcast %31 : vector<1x64xf32> to vector<8x64xf32>
    %52 = arith.mulf %50, %51 : vector<8x64xf32>
    %53 = vector.broadcast %32 : vector<1x64xf32> to vector<8x64xf32>
    %54 = arith.addf %52, %53 : vector<8x64xf32>
    %cst_15 = arith.constant 0.000000e+00 : f32
    %55 = vector.broadcast %cst_15 : f32 to vector<8x64xf32>
    %56 = arith.cmpf oge, %54, %55 : vector<8x64xf32>
    %cst_16 = arith.constant 0.00999999977 : f32
    %57 = vector.broadcast %cst_16 : f32 to vector<8x64xf32>
    %58 = arith.mulf %57, %54 : vector<8x64xf32>
    %59 = arith.select %56, %54, %58 : vector<8x64xi1>, vector<8x64xf32>
    %c0_17 = arith.constant 0 : index
    %c0_18 = arith.constant 0 : index
    %60 = vector.load %arg2[%c0_17, %c0_18] : memref<64x192xf32, #tpu.memory_space<vmem>>, vector<64x192xf32>
    %cst_19 = arith.constant dense<0.000000e+00> : vector<8x192xf32>
    %61 = tpu.matmul %59, %60, %cst_19 {dimension_numbers = #tpu.dot_dimension_numbers<[1], [0], [0], [1], [0, 0, 1, 1], [], []>, precision = #tpu.contract_precision<fp32>} : vector<8x64xf32>, vector<64x192xf32>, vector<8x192xf32> -> vector<8x192xf32>
    %62 = vector.extract_strided_slice %1 {offsets = [11, 0], sizes = [1, 192], strides = [1, 1]} : vector<14x192xf32> to vector<1x192xf32>
    %63 = vector.broadcast %62 : vector<1x192xf32> to vector<8x192xf32>
    %64 = arith.addf %61, %63 : vector<8x192xf32>
    %65 = vector.extract_strided_slice %64 {offsets = [0, 0], sizes = [8, 16], strides = [1, 1]} : vector<8x192xf32> to vector<8x16xf32>
    %66 = vector.extract_strided_slice %64 {offsets = [0, 16], sizes = [8, 16], strides = [1, 1]} : vector<8x192xf32> to vector<8x16xf32>
    %67 = vector.extract_strided_slice %64 {offsets = [0, 32], sizes = [8, 16], strides = [1, 1]} : vector<8x192xf32> to vector<8x16xf32>
    %68 = tpu.transpose %66, [1, 0] : vector<8x16xf32> -> vector<16x8xf32>
    %cst_20 = arith.constant dense<0.000000e+00> : vector<8x8xf32>
    %69 = tpu.matmul %65, %68, %cst_20 {dimension_numbers = #tpu.dot_dimension_numbers<[1], [0], [0], [1], [0, 0, 1, 1], [], []>, precision = #tpu.contract_precision<fp32>} : vector<8x16xf32>, vector<16x8xf32>, vector<8x8xf32> -> vector<8x8xf32>
    %cst_21 = arith.constant 2.500000e-01 : f32
    %70 = vector.broadcast %cst_21 : f32 to vector<8x8xf32>
    %71 = arith.mulf %69, %70 : vector<8x8xf32>
    %cst_22 = arith.constant dense<0xFF800000> : vector<8xf32>
    %72 = vector.multi_reduction <maximumf>, %71, %cst_22 [1] : vector<8x8xf32> to vector<8xf32>
    %73 = vector.shape_cast %72 : vector<8xf32> to vector<8x1xf32>
    %74 = vector.broadcast %73 : vector<8x1xf32> to vector<8x8xf32>
    %75 = arith.subf %71, %74 : vector<8x8xf32>
    %76 = math.exp %75 : vector<8x8xf32>
    %cst_23 = arith.constant dense<0.000000e+00> : vector<8xf32>
    %77 = vector.multi_reduction <add>, %76, %cst_23 [1] : vector<8x8xf32> to vector<8xf32>
    %78 = vector.shape_cast %77 : vector<8xf32> to vector<8x1xf32>
    %79 = vector.broadcast %78 : vector<8x1xf32> to vector<8x8xf32>
    %80 = arith.divf %76, %79 : vector<8x8xf32>
    %cst_24 = arith.constant dense<0.000000e+00> : vector<8x16xf32>
    %81 = tpu.matmul %80, %67, %cst_24 {dimension_numbers = #tpu.dot_dimension_numbers<[1], [0], [0], [1], [0, 0, 1, 1], [], []>, precision = #tpu.contract_precision<fp32>} : vector<8x8xf32>, vector<8x16xf32>, vector<8x16xf32> -> vector<8x16xf32>
    %c0_25 = arith.constant 0 : index
    %c0_26 = arith.constant 0 : index
    %82 = vector.load %arg9[%c0_25, %c0_26] : memref<8x64xf32, #tpu.memory_space<vmem>>, vector<8x16xf32>
    tpu.vector_store %arg9[%c0_25, %c0_26], %81 {strides = array<i32>} : memref<8x64xf32, #tpu.memory_space<vmem>>, vector<8x16xf32>,
    %83 = vector.extract_strided_slice %64 {offsets = [0, 48], sizes = [8, 16], strides = [1, 1]} : vector<8x192xf32> to vector<8x16xf32>
    %84 = vector.extract_strided_slice %64 {offsets = [0, 64], sizes = [8, 16], strides = [1, 1]} : vector<8x192xf32> to vector<8x16xf32>
    %85 = vector.extract_strided_slice %64 {offsets = [0, 80], sizes = [8, 16], strides = [1, 1]} : vector<8x192xf32> to vector<8x16xf32>
    %86 = tpu.transpose %84, [1, 0] : vector<8x16xf32> -> vector<16x8xf32>
    %cst_27 = arith.constant dense<0.000000e+00> : vector<8x8xf32>
    %87 = tpu.matmul %83, %86, %cst_27 {dimension_numbers = #tpu.dot_dimension_numbers<[1], [0], [0], [1], [0, 0, 1, 1], [], []>, precision = #tpu.contract_precision<fp32>} : vector<8x16xf32>, vector<16x8xf32>, vector<8x8xf32> -> vector<8x8xf32>
    %cst_28 = arith.constant 2.500000e-01 : f32
    %88 = vector.broadcast %cst_28 : f32 to vector<8x8xf32>
    %89 = arith.mulf %87, %88 : vector<8x8xf32>
    %cst_29 = arith.constant dense<0xFF800000> : vector<8xf32>
    %90 = vector.multi_reduction <maximumf>, %89, %cst_29 [1] : vector<8x8xf32> to vector<8xf32>
    %91 = vector.shape_cast %90 : vector<8xf32> to vector<8x1xf32>
    %92 = vector.broadcast %91 : vector<8x1xf32> to vector<8x8xf32>
    %93 = arith.subf %89, %92 : vector<8x8xf32>
    %94 = math.exp %93 : vector<8x8xf32>
    %cst_30 = arith.constant dense<0.000000e+00> : vector<8xf32>
    %95 = vector.multi_reduction <add>, %94, %cst_30 [1] : vector<8x8xf32> to vector<8xf32>
    %96 = vector.shape_cast %95 : vector<8xf32> to vector<8x1xf32>
    %97 = vector.broadcast %96 : vector<8x1xf32> to vector<8x8xf32>
    %98 = arith.divf %94, %97 : vector<8x8xf32>
    %cst_31 = arith.constant dense<0.000000e+00> : vector<8x16xf32>
    %99 = tpu.matmul %98, %85, %cst_31 {dimension_numbers = #tpu.dot_dimension_numbers<[1], [0], [0], [1], [0, 0, 1, 1], [], []>, precision = #tpu.contract_precision<fp32>} : vector<8x8xf32>, vector<8x16xf32>, vector<8x16xf32> -> vector<8x16xf32>
    %c0_32 = arith.constant 0 : index
    %c16 = arith.constant 16 : index
    %100 = vector.load %arg9[%c0_32, %c16] : memref<8x64xf32, #tpu.memory_space<vmem>>, vector<8x16xf32>
    tpu.vector_store %arg9[%c0_32, %c16], %99 {strides = array<i32>} : memref<8x64xf32, #tpu.memory_space<vmem>>, vector<8x16xf32>,
    %101 = vector.extract_strided_slice %64 {offsets = [0, 96], sizes = [8, 16], strides = [1, 1]} : vector<8x192xf32> to vector<8x16xf32>
    %102 = vector.extract_strided_slice %64 {offsets = [0, 112], sizes = [8, 16], strides = [1, 1]} : vector<8x192xf32> to vector<8x16xf32>
    %103 = vector.extract_strided_slice %64 {offsets = [0, 128], sizes = [8, 16], strides = [1, 1]} : vector<8x192xf32> to vector<8x16xf32>
    %104 = tpu.transpose %102, [1, 0] : vector<8x16xf32> -> vector<16x8xf32>
    %cst_33 = arith.constant dense<0.000000e+00> : vector<8x8xf32>
    %105 = tpu.matmul %101, %104, %cst_33 {dimension_numbers = #tpu.dot_dimension_numbers<[1], [0], [0], [1], [0, 0, 1, 1], [], []>, precision = #tpu.contract_precision<fp32>} : vector<8x16xf32>, vector<16x8xf32>, vector<8x8xf32> -> vector<8x8xf32>
    %cst_34 = arith.constant 2.500000e-01 : f32
    %106 = vector.broadcast %cst_34 : f32 to vector<8x8xf32>
    %107 = arith.mulf %105, %106 : vector<8x8xf32>
    %cst_35 = arith.constant dense<0xFF800000> : vector<8xf32>
    %108 = vector.multi_reduction <maximumf>, %107, %cst_35 [1] : vector<8x8xf32> to vector<8xf32>
    %109 = vector.shape_cast %108 : vector<8xf32> to vector<8x1xf32>
    %110 = vector.broadcast %109 : vector<8x1xf32> to vector<8x8xf32>
    %111 = arith.subf %107, %110 : vector<8x8xf32>
    %112 = math.exp %111 : vector<8x8xf32>
    %cst_36 = arith.constant dense<0.000000e+00> : vector<8xf32>
    %113 = vector.multi_reduction <add>, %112, %cst_36 [1] : vector<8x8xf32> to vector<8xf32>
    %114 = vector.shape_cast %113 : vector<8xf32> to vector<8x1xf32>
    %115 = vector.broadcast %114 : vector<8x1xf32> to vector<8x8xf32>
    %116 = arith.divf %112, %115 : vector<8x8xf32>
    %cst_37 = arith.constant dense<0.000000e+00> : vector<8x16xf32>
    %117 = tpu.matmul %116, %103, %cst_37 {dimension_numbers = #tpu.dot_dimension_numbers<[1], [0], [0], [1], [0, 0, 1, 1], [], []>, precision = #tpu.contract_precision<fp32>} : vector<8x8xf32>, vector<8x16xf32>, vector<8x16xf32> -> vector<8x16xf32>
    %c0_38 = arith.constant 0 : index
    %c32 = arith.constant 32 : index
    %118 = vector.load %arg9[%c0_38, %c32] : memref<8x64xf32, #tpu.memory_space<vmem>>, vector<8x16xf32>
    tpu.vector_store %arg9[%c0_38, %c32], %117 {strides = array<i32>} : memref<8x64xf32, #tpu.memory_space<vmem>>, vector<8x16xf32>,
    %119 = vector.extract_strided_slice %64 {offsets = [0, 144], sizes = [8, 16], strides = [1, 1]} : vector<8x192xf32> to vector<8x16xf32>
    %120 = vector.extract_strided_slice %64 {offsets = [0, 160], sizes = [8, 16], strides = [1, 1]} : vector<8x192xf32> to vector<8x16xf32>
    %121 = vector.extract_strided_slice %64 {offsets = [0, 176], sizes = [8, 16], strides = [1, 1]} : vector<8x192xf32> to vector<8x16xf32>
    %122 = tpu.transpose %120, [1, 0] : vector<8x16xf32> -> vector<16x8xf32>
    %cst_39 = arith.constant dense<0.000000e+00> : vector<8x8xf32>
    %123 = tpu.matmul %119, %122, %cst_39 {dimension_numbers = #tpu.dot_dimension_numbers<[1], [0], [0], [1], [0, 0, 1, 1], [], []>, precision = #tpu.contract_precision<fp32>} : vector<8x16xf32>, vector<16x8xf32>, vector<8x8xf32> -> vector<8x8xf32>
    %cst_40 = arith.constant 2.500000e-01 : f32
    %124 = vector.broadcast %cst_40 : f32 to vector<8x8xf32>
    %125 = arith.mulf %123, %124 : vector<8x8xf32>
    %cst_41 = arith.constant dense<0xFF800000> : vector<8xf32>
    %126 = vector.multi_reduction <maximumf>, %125, %cst_41 [1] : vector<8x8xf32> to vector<8xf32>
    %127 = vector.shape_cast %126 : vector<8xf32> to vector<8x1xf32>
    %128 = vector.broadcast %127 : vector<8x1xf32> to vector<8x8xf32>
    %129 = arith.subf %125, %128 : vector<8x8xf32>
    %130 = math.exp %129 : vector<8x8xf32>
    %cst_42 = arith.constant dense<0.000000e+00> : vector<8xf32>
    %131 = vector.multi_reduction <add>, %130, %cst_42 [1] : vector<8x8xf32> to vector<8xf32>
    %132 = vector.shape_cast %131 : vector<8xf32> to vector<8x1xf32>
    %133 = vector.broadcast %132 : vector<8x1xf32> to vector<8x8xf32>
    %134 = arith.divf %130, %133 : vector<8x8xf32>
    %cst_43 = arith.constant dense<0.000000e+00> : vector<8x16xf32>
    %135 = tpu.matmul %134, %121, %cst_43 {dimension_numbers = #tpu.dot_dimension_numbers<[1], [0], [0], [1], [0, 0, 1, 1], [], []>, precision = #tpu.contract_precision<fp32>} : vector<8x8xf32>, vector<8x16xf32>, vector<8x16xf32> -> vector<8x16xf32>
    %c0_44 = arith.constant 0 : index
    %c48 = arith.constant 48 : index
    %136 = vector.load %arg9[%c0_44, %c48] : memref<8x64xf32, #tpu.memory_space<vmem>>, vector<8x16xf32>
    tpu.vector_store %arg9[%c0_44, %c48], %135 {strides = array<i32>} : memref<8x64xf32, #tpu.memory_space<vmem>>, vector<8x16xf32>,
    %c0_45 = arith.constant 0 : index
    %c0_46 = arith.constant 0 : index
    %137 = vector.load %arg9[%c0_45, %c0_46] : memref<8x64xf32, #tpu.memory_space<vmem>>, vector<8x64xf32>
    %c0_47 = arith.constant 0 : index
    %c0_48 = arith.constant 0 : index
    %138 = vector.load %arg3[%c0_47, %c0_48] : memref<64x64xf32, #tpu.memory_space<vmem>>, vector<64x64xf32>
    %cst_49 = arith.constant dense<0.000000e+00> : vector<8x64xf32>
    %139 = tpu.matmul %137, %138, %cst_49 {dimension_numbers = #tpu.dot_dimension_numbers<[1], [0], [0], [1], [0, 0, 1, 1], [], []>, precision = #tpu.contract_precision<fp32>} : vector<8x64xf32>, vector<64x64xf32>, vector<8x64xf32> -> vector<8x64xf32>
    %140 = vector.extract_strided_slice %1 {offsets = [5, 0], sizes = [1, 64], strides = [1, 1]} : vector<14x192xf32> to vector<1x64xf32>
    %141 = vector.broadcast %140 : vector<1x64xf32> to vector<8x64xf32>
    %142 = arith.addf %139, %141 : vector<8x64xf32>
    %c0_50 = arith.constant 0 : index
    %c0_51 = arith.constant 0 : index
    %143 = vector.load %arg4[%c0_50, %c0_51] : memref<64x32xf32, #tpu.memory_space<vmem>>, vector<64x32xf32>
    %cst_52 = arith.constant dense<0.000000e+00> : vector<8x32xf32>
    %144 = tpu.matmul %142, %143, %cst_52 {dimension_numbers = #tpu.dot_dimension_numbers<[1], [0], [0], [1], [0, 0, 1, 1], [], []>, precision = #tpu.contract_precision<fp32>} : vector<8x64xf32>, vector<64x32xf32>, vector<8x32xf32> -> vector<8x32xf32>
    %145 = vector.extract_strided_slice %1 {offsets = [6, 0], sizes = [1, 32], strides = [1, 1]} : vector<14x192xf32> to vector<1x32xf32>
    %146 = vector.broadcast %145 : vector<1x32xf32> to vector<8x32xf32>
    %147 = arith.addf %144, %146 : vector<8x32xf32>
    %148 = vector.extract_strided_slice %1 {offsets = [7, 0], sizes = [1, 32], strides = [1, 1]} : vector<14x192xf32> to vector<1x32xf32>
    %149 = vector.extract_strided_slice %1 {offsets = [8, 0], sizes = [1, 32], strides = [1, 1]} : vector<14x192xf32> to vector<1x32xf32>
    %cst_53 = arith.constant dense<0.000000e+00> : vector<8xf32>
    %150 = vector.multi_reduction <add>, %147, %cst_53 [1] : vector<8x32xf32> to vector<8xf32>
    %151 = vector.shape_cast %150 : vector<8xf32> to vector<8x1xf32>
    %cst_54 = arith.constant 3.200000e+01 : f32
    %152 = vector.broadcast %cst_54 : f32 to vector<8x1xf32>
    %153 = arith.divf %151, %152 : vector<8x1xf32>
    %154 = vector.broadcast %153 : vector<8x1xf32> to vector<8x32xf32>
    %155 = arith.subf %147, %154 : vector<8x32xf32>
    %156 = arith.mulf %155, %155 : vector<8x32xf32>
    %cst_55 = arith.constant dense<0.000000e+00> : vector<8xf32>
    %157 = vector.multi_reduction <add>, %156, %cst_55 [1] : vector<8x32xf32> to vector<8xf32>
    %158 = vector.shape_cast %157 : vector<8xf32> to vector<8x1xf32>
    %cst_56 = arith.constant 3.200000e+01 : f32
    %159 = vector.broadcast %cst_56 : f32 to vector<8x1xf32>
    %160 = arith.divf %158, %159 : vector<8x1xf32>
    %161 = vector.broadcast %153 : vector<8x1xf32> to vector<8x32xf32>
    %162 = arith.subf %147, %161 : vector<8x32xf32>
    %cst_57 = arith.constant 9.99999974E-5 : f32
    %163 = vector.broadcast %cst_57 : f32 to vector<8x1xf32>
    %164 = arith.addf %160, %163 : vector<8x1xf32>
    %165 = math.rsqrt %164 : vector<8x1xf32>
    %166 = vector.broadcast %165 : vector<8x1xf32> to vector<8x32xf32>
    %167 = arith.mulf %162, %166 : vector<8x32xf32>
    %168 = vector.broadcast %148 : vector<1x32xf32> to vector<8x32xf32>
    %169 = arith.mulf %167, %168 : vector<8x32xf32>
    %170 = vector.broadcast %149 : vector<1x32xf32> to vector<8x32xf32>
    %171 = arith.addf %169, %170 : vector<8x32xf32>
    %172 = vector.extract_strided_slice %1 {offsets = [9, 0], sizes = [1, 32], strides = [1, 1]} : vector<14x192xf32> to vector<1x32xf32>
    %173 = vector.extract_strided_slice %1 {offsets = [10, 0], sizes = [1, 32], strides = [1, 1]} : vector<14x192xf32> to vector<1x32xf32>
    %cst_58 = arith.constant dense<0.000000e+00> : vector<32xf32>
    %174 = vector.multi_reduction <add>, %171, %cst_58 [0] : vector<8x32xf32> to vector<32xf32>
    %175 = vector.shape_cast %174 : vector<32xf32> to vector<1x32xf32>
    %cst_59 = arith.constant 8.000000e+00 : f32
    %176 = vector.broadcast %cst_59 : f32 to vector<1x32xf32>
    %177 = arith.divf %175, %176 : vector<1x32xf32>
    %178 = vector.broadcast %177 : vector<1x32xf32> to vector<8x32xf32>
    %179 = arith.subf %171, %178 : vector<8x32xf32>
    %180 = arith.mulf %179, %179 : vector<8x32xf32>
    %cst_60 = arith.constant dense<0.000000e+00> : vector<32xf32>
    %181 = vector.multi_reduction <add>, %180, %cst_60 [0] : vector<8x32xf32> to vector<32xf32>
    %182 = vector.shape_cast %181 : vector<32xf32> to vector<1x32xf32>
    %cst_61 = arith.constant 8.000000e+00 : f32
    %183 = vector.broadcast %cst_61 : f32 to vector<1x32xf32>
    %184 = arith.divf %182, %183 : vector<1x32xf32>
    %185 = vector.broadcast %177 : vector<1x32xf32> to vector<8x32xf32>
    %186 = arith.subf %171, %185 : vector<8x32xf32>
    %cst_62 = arith.constant 9.99999974E-5 : f32
    %187 = vector.broadcast %cst_62 : f32 to vector<1x32xf32>
    %188 = arith.addf %184, %187 : vector<1x32xf32>
    %189 = math.rsqrt %188 : vector<1x32xf32>
    %190 = vector.broadcast %189 : vector<1x32xf32> to vector<8x32xf32>
    %191 = arith.mulf %186, %190 : vector<8x32xf32>
    %192 = vector.broadcast %172 : vector<1x32xf32> to vector<8x32xf32>
    %193 = arith.mulf %191, %192 : vector<8x32xf32>
    %194 = vector.broadcast %173 : vector<1x32xf32> to vector<8x32xf32>
    %195 = arith.addf %193, %194 : vector<8x32xf32>
    %cst_63 = arith.constant 0.000000e+00 : f32
    %196 = vector.broadcast %cst_63 : f32 to vector<8x32xf32>
    %197 = arith.cmpf oge, %195, %196 : vector<8x32xf32>
    %cst_64 = arith.constant 0.00999999977 : f32
    %198 = vector.broadcast %cst_64 : f32 to vector<8x32xf32>
    %199 = arith.mulf %198, %195 : vector<8x32xf32>
    %200 = arith.select %197, %195, %199 : vector<8x32xi1>, vector<8x32xf32>
    %c0_65 = arith.constant 0 : index
    %c0_66 = arith.constant 0 : index
    %201 = vector.load %arg5[%c0_65, %c0_66] : memref<32x16xf32, #tpu.memory_space<vmem>>, vector<32x16xf32>
    %cst_67 = arith.constant dense<0.000000e+00> : vector<8x16xf32>
    %202 = tpu.matmul %200, %201, %cst_67 {dimension_numbers = #tpu.dot_dimension_numbers<[1], [0], [0], [1], [0, 0, 1, 1], [], []>, precision = #tpu.contract_precision<fp32>} : vector<8x32xf32>, vector<32x16xf32>, vector<8x16xf32> -> vector<8x16xf32>
    %203 = vector.extract_strided_slice %1 {offsets = [12, 0], sizes = [1, 16], strides = [1, 1]} : vector<14x192xf32> to vector<1x16xf32>
    %204 = vector.broadcast %203 : vector<1x16xf32> to vector<8x16xf32>
    %205 = arith.addf %202, %204 : vector<8x16xf32>
    %cst_68 = arith.constant 0.000000e+00 : f32
    %206 = vector.broadcast %cst_68 : f32 to vector<8x16xf32>
    %207 = arith.cmpf oge, %205, %206 : vector<8x16xf32>
    %cst_69 = arith.constant 0.00999999977 : f32
    %208 = vector.broadcast %cst_69 : f32 to vector<8x16xf32>
    %209 = arith.mulf %208, %205 : vector<8x16xf32>
    %210 = arith.select %207, %205, %209 : vector<8x16xi1>, vector<8x16xf32>
    %c0_70 = arith.constant 0 : index
    %c0_71 = arith.constant 0 : index
    %211 = vector.load %arg6[%c0_70, %c0_71] : memref<16x32xf32, #tpu.memory_space<vmem>>, vector<16x32xf32>
    %cst_72 = arith.constant dense<0.000000e+00> : vector<8x32xf32>
    %212 = tpu.matmul %210, %211, %cst_72 {dimension_numbers = #tpu.dot_dimension_numbers<[1], [0], [0], [1], [0, 0, 1, 1], [], []>, precision = #tpu.contract_precision<fp32>} : vector<8x16xf32>, vector<16x32xf32>, vector<8x32xf32> -> vector<8x32xf32>
    %213 = vector.extract_strided_slice %1 {offsets = [13, 0], sizes = [1, 32], strides = [1, 1]} : vector<14x192xf32> to vector<1x32xf32>
    %214 = vector.broadcast %213 : vector<1x32xf32> to vector<8x32xf32>
    %215 = arith.addf %212, %214 : vector<8x32xf32>
    %c0_73 = arith.constant 0 : index
    %c0_74 = arith.constant 0 : index
    %216 = vector.load %arg8[%c0_73, %c0_74] : memref<8x48xf32, #tpu.memory_space<vmem>>, vector<8x16xf32>
    tpu.vector_store %arg8[%c0_73, %c0_74], %210 {strides = array<i32>} : memref<8x48xf32, #tpu.memory_space<vmem>>, vector<8x16xf32>,
    %c0_75 = arith.constant 0 : index
    %c16_76 = arith.constant 16 : index
    %217 = vector.load %arg8[%c0_75, %c16_76] : memref<8x48xf32, #tpu.memory_space<vmem>>, vector<8x32xf32>
    tpu.vector_store %arg8[%c0_75, %c16_76], %215 {strides = array<i32>} : memref<8x48xf32, #tpu.memory_space<vmem>>, vector<8x32xf32>,
    return
  }
}

</mosaic_0001>

<bundles_post_ra>
// kernel: tpu_custom_call.1
= control target key start
LH: loop header
LB: loop body
LE: loop exit
PB: predicated region body
PF: predicated region fallthrough
CT: control target
= control target key end

     0   :  { %13 = vsyncpa [#allocation4], 0  ;;  %s9731_s0 = inlined_call_operand.hbm [shape: f32[8,32], index: 0, kind: input, shape index: {}]   ;;  %s9732_s1 = inlined_call_operand.hbm [shape: f32[32,64], index: 1, kind: input, shape index: {}]   ;;  %s9733_s2 = inlined_call_operand.vmem [shape: f32[64,192], index: 2, kind: input, shape index: {}]   ;;  %s9734_s3 = inlined_call_operand.hbm [shape: f32[64,64], index: 3, kind: input, shape index: {}]   ;;  %s9735_s4 = inlined_call_operand.vmem [shape: f32[64,32], index: 4, kind: input, shape index: {}]   ;;  %s9736_s5 = inlined_call_operand.vmem [shape: f32[32,16], index: 5, kind: input, shape index: {}]   ;;  %s9737_s6 = inlined_call_operand.hbm [shape: f32[16,32], index: 6, kind: input, shape index: {}]   ;;  %s9738_s7 = inlined_call_operand.vmem [shape: f32[14,192], index: 7, kind: input, shape index: {}]   ;;  %s9739_s8 = inlined_call_operand.hbm [shape: f32[8,48], index: 8, kind: output, shape index: {}]  }
   0x1   :  { %14 = vsyncpa [#allocation7], 0 }
   0x2   :  { %15 = vsyncpa [#allocation10], 0 }
   0x3   :  { %16 = vsyncpa [#allocation5], 0  ;;  %s8722_s27 = smov [#allocation6]   ;;  %s8604_s9 = scalar_lea.hbm %s9732_s1, 512 }
   0x4   :  { %s32_s28 = sshll.u32 %s8722_s27, 4  ;;  %p8605_p0 = scmp.ne.s32.totalorder %s9732_s1, %s8604_s9  ;;  %s33_s28 = int_to_ptr.vmem [resolvable:$true] %s32_s28 }
   0x5   :  { %p8608_p1 = scmp.lt.u32.totalorder %s8604_s9, %s9732_s1 }
   0x7   :  { %p8610_p2 = pnand %p8608_p1, %p8605_p0 }
   0x9   :  { %8613 = shalt.err (!%p8610_p2)
}
   0xa   :  { %s8614_s14 = scalar_lea.vmem %s33_s28, 512  ;;  %p8619_p4 = scmp.lt.s32.totalorder %s33_s28, %s33_s28 }
   0xb   :  { %p8615_p3 = scmp.ne.s32.totalorder %s33_s28, %s8614_s14  ;;  %p8620_p5 = scmp.lt.s32.totalorder %s8614_s14, %s8614_s14 }
   0xd   :  { %p8621_p6 = por %p8620_p5, %p8619_p4 }
   0xf   :  { %p8622_p7 = pnand %p8621_p6, %p8615_p3 }
  0x11   :  { %8625 = shalt.err (!%p8622_p7)
}
  0x12   :  { %s8723_s15 = smov 128   ;;  %s8724_s16 = smov 8  }
  0x13   :  { %38 = dma.hbm_to_vmem [thread:$0]  %s9732_s1, 512, %s33_s28, [#allocation7], %s8723_s15, %s8723_s15, %s8724_s16  }
  0x14   :  { %s8725_s19 = smov [#allocation3]   ;;  %s8726_s21 = smov [#allocation8]  }
  0x15   :  { %s23_s20 = sshll.u32 %s8725_s19, 4  ;;  %s46_s22 = sshll.u32 %s8726_s21, 4  ;;  %s24_s20 = int_to_ptr.vmem [resolvable:$true] %s23_s20  ;;  %s47_s22 = int_to_ptr.vmem [resolvable:$true] %s46_s22 }
  0x16   :  { %s8626_s25 = scalar_lea.hbm %s9731_s0, 128 }
  0x17   :  { %p8627_p8 = scmp.ne.s32.totalorder %s9731_s0, %s8626_s25  ;;  %p8630_p9 = scmp.lt.u32.totalorder %s8626_s25, %s9731_s0 }
  0x19   :  { %p8632_p10 = pnand %p8630_p9, %p8627_p8 }
  0x1b   :  { %8635 = shalt.err (!%p8632_p10)
}
  0x1c   :  { %s8636_s1 = scalar_lea.vmem %s24_s20, 128  ;;  %p8641_p12 = scmp.lt.s32.totalorder %s24_s20, %s24_s20 }
  0x1d   :  { %p8637_p11 = scmp.ne.s32.totalorder %s24_s20, %s8636_s1  ;;  %p8642_p13 = scmp.lt.s32.totalorder %s8636_s1, %s8636_s1 }
  0x1f   :  { %p8643_p0 = por %p8642_p13, %p8641_p12 }
  0x21   :  { %p8644_p1 = pnand %p8643_p0, %p8637_p11 }
  0x23   :  { %8647 = shalt.err (!%p8644_p1)
}
  0x24   :  { %26 = dma.hbm_to_vmem [thread:$0]  %s9731_s0, 128, %s24_s20, [#allocation4]  }
  0x25   :  { %s8648_s12 = scalar_lea.hbm %s9734_s3, 1024 }
  0x26   :  { %p8649_p2 = scmp.ne.s32.totalorder %s9734_s3, %s8648_s12  ;;  %p8652_p3 = scmp.lt.u32.totalorder %s8648_s12, %s9734_s3 }
  0x28   :  { %p8654_p4 = pnand %p8652_p3, %p8649_p2 }
  0x2a   :  { %8657 = shalt.err (!%p8654_p4)
}
  0x2b   :  { %s8658_s19 = scalar_lea.vmem %s47_s22, 1024  ;;  %p8663_p6 = scmp.lt.s32.totalorder %s47_s22, %s47_s22 }
  0x2c   :  { %p8659_p5 = scmp.ne.s32.totalorder %s47_s22, %s8658_s19  ;;  %p8664_p7 = scmp.lt.s32.totalorder %s8658_s19, %s8658_s19 }
  0x2e   :  { %p8665_p8 = por %p8664_p7, %p8663_p6 }
  0x30   :  { %p8666_p9 = pnand %p8665_p8, %p8659_p5 }
  0x32   :  { %8669 = shalt.err (!%p8666_p9)
}
  0x33   :  { %52 = dma.hbm_to_vmem [thread:$0]  %s9734_s3, 1024, %s47_s22, [#allocation7], %s8723_s15, %s8723_s15, %s8724_s16  }
  0x34   :  { %s8727_s21 = smov [#allocation9]   ;;  %s8670_s26 = scalar_lea.hbm %s9737_s6, 256 }
  0x35   :  { %s62_s23 = sshll.u32 %s8727_s21, 4  ;;  %p8671_p10 = scmp.ne.s32.totalorder %s9737_s6, %s8670_s26  ;;  %s63_s23 = int_to_ptr.vmem [resolvable:$true] %s62_s23 }
  0x36   :  { %p8674_p11 = scmp.lt.u32.totalorder %s8670_s26, %s9737_s6 }
  0x38   :  { %p8676_p12 = pnand %p8674_p11, %p8671_p10 }
  0x3a   :  { %8679 = shalt.err (!%p8676_p12)
}
  0x3b   :  { %s8680_s28 = scalar_lea.vmem %s63_s23, 256  ;;  %p8685_p0 = scmp.lt.s32.totalorder %s63_s23, %s63_s23 }
  0x3c   :  { %p8681_p13 = scmp.ne.s32.totalorder %s63_s23, %s8680_s28  ;;  %p8686_p1 = scmp.lt.s32.totalorder %s8680_s28, %s8680_s28 }
  0x3e   :  { %p8687_p2 = por %p8686_p1, %p8685_p0 }
  0x40   :  { %p8688_p3 = pnand %p8687_p2, %p8681_p13 }
  0x42   :  { %8691 = shalt.err (!%p8688_p3)
}
  0x43   :  { %68 = dma.hbm_to_vmem [thread:$0]  %s9737_s6, 256, %s63_s23, [#allocation10], %s8723_s15, %s8723_s15, %s8724_s16  }
  0x44   :  { %8714 = dma.done.wait [#allocation4], 128  }
  0x45   :  { %8715 = vsyncadd [#allocation4], 4294967168 }
  0x46   :  { %8716 = dma.done.wait [#allocation7], 1536  }
  0x47   :  { %8717 = vsyncadd [#allocation7], 4294965760 }
  0x48   :  { %8718 = dma.done.wait [#allocation10], 256  }
  0x49   :  { %8719 = vsyncadd [#allocation10], 4294967040  ;;  %v9741_v0 = vmov 0.0|0.0   ;;  %vm8729_vm0 = vmmov 0   ;;  %v8730_v1 = vmov 0.0   ;;  %vm95_vm1 = vcmask 261120  }
  0x4a   :  { %8092 = vmatprep.subr.bf16.mxu0 %v9741_v0  ;;  %7463 = vmatprep.mubr.msk.f32.mxu0 %vm8729_vm0, %v8730_v1  ;;  %v87_v2 = vld [vmem:[#allocation6] sm:$0xff]  ;;  %v88_v3 = vld [vmem:[#allocation6 + $0x8] sm:$0xff]  ;;  %v89_v4 = vld [vmem:[#allocation6 + $0x10] sm:$0xff]  ;;  %v91_v43 = vlaneseq  ;;  %vm584_vm2 = vcmask 523264   ;;  %s8731_s17 = smov 112   ;;  %vm1321_vm4 = vcmask 130048  }
  0x4b   :  { %8086 = vmatprep.subr.bf16.mxu1 %v9741_v0  ;;  %7452 = vmatprep.mubr.msk.f32.mxu1 %vm8729_vm0, %v8730_v1  ;;  %v100_v5 = vand.u32 4294901760, %v87_v2  ;;  %v103_v6 = vand.u32 4294901760, %v88_v3  ;;  %v90_v7 = vld [vmem:[#allocation6 + $0x18] sm:$0xff]  ;;  %v106_v8 = vand.u32 4294901760, %v89_v4  ;;  %v8876_v46 = vld [vmem:[%s9738_s7] sm:$0xff]  ;;  %v647_v59 = vld [vmem:[%s9733_s2 + $0x18] sm:$0xff] }
  0x4c   :  { %v83_v9 = vld [vmem:[#allocation3] sm:$0xff]  ;;  %v109_v10 = vand.u32 4294901760, %v90_v7  ;;  %v8870_v44 = vshrl.u32 %v91_v43, 7  ;;  %v675_v61 = vand.u32 4294901760, %v647_v59  ;;  %v644_v62 = vld [vmem:[%s9733_s2] sm:$0xff]  ;;  %v646_v63 = vld [vmem:[%s9733_s2 + $0x10] sm:$0xff] }
  0x4d   :  { %v97_v11 = vsel %vm95_vm1, %v83_v9, 0  ;;  %v180_v12 = vsub.f32 %v87_v2, %v100_v5  ;;  %v187_v13 = vsub.f32 %v88_v3, %v103_v6  ;;  %v194_v14 = vsub.f32 %v89_v4, %v106_v8  ;;  %v645_v58 = vld [vmem:[%s9733_s2 + $0x8] sm:$0xff]  ;;  %s8732_s18 = smov 32   ;;  %s8733_s19 = smov 96  }
  0x4e   :  { %v201_v15 = vsub.f32 %v90_v7, %v109_v10  ;;  %v168_v16 = vand.u32 4294901760, %v97_v11  ;;  %v8087_v17 = vpack.c.bf16 %v103_v6, %v100_v5  ;;  %v8090_v27 = vpack.c.bf16 %v109_v10, %v106_v8  ;;  %v649_v4 = vld [vmem:[%s9733_s2 + $0x28] sm:$0xff]  ;;  %v651_v5 = vld [vmem:[%s9733_s2 + $0x38] sm:$0xff]  ;;  %v648_v6 = vld [vmem:[%s9733_s2 + $0x20] sm:$0xff]  ;;  %s8734_s0 = smov 80   ;;  %s8735_s23 = smov 64  }
  0x4f   :  { %v181_v18 = vand.u32 4294901760, %v180_v12  ;;  %v188_v19 = vand.u32 4294901760, %v187_v13  ;;  %v195_v20 = vand.u32 4294901760, %v194_v14  ;;  %v8099_v37 = vpack.c.bf16 %v187_v13, %v180_v12  ;;  %s8736_s24 = smov 16   ;;  %s8737_s25 = smov 48  }
  0x50   :  { %v202_v21 = vand.u32 4294901760, %v201_v15  ;;  %v169_v22 = vsub.f32 %v97_v11, %v168_v16  ;;  %8088 = vmatpush3.bf16.msra.mxu1 %v8087_v17  ;;  %v8102_v38 = vpack.c.bf16 %v201_v15, %v194_v14  ;;  %v9740_v45 = vsub.s32 0, %v8870_v44  ;;  %v650_v11 = vld [vmem:[%s9733_s2 + $0x30] sm:$0xff] }
  0x51   :  { %v182_v23 = vsub.f32 %v180_v12, %v181_v18  ;;  %v189_v24 = vsub.f32 %v187_v13, %v188_v19  ;;  %v196_v25 = vsub.f32 %v194_v14, %v195_v20  ;;  %8089 = vmatprep.subr.bf16.mxu1 %v9741_v0  ;;  %v8111_v39 = vpack.c.bf16 %v188_v19, %v181_v18  ;;  %v653_v12 = vld [vmem:[%s9733_s2 + $0x48] sm:$0xff]  ;;  %v655_v13 = vld [vmem:[%s9733_s2 + $0x58] sm:$0xff]  ;;  %v652_v18 = vld [vmem:[%s9733_s2 + $0x40] sm:$0xff] }
  0x52   :  { %v203_v26 = vsub.f32 %v201_v15, %v202_v21  ;;  %v170_v28 = vand.u32 4294901760, %v169_v22  ;;  %v8114_v40 = vpack.c.bf16 %v202_v21, %v195_v20  ;;  %v94_v47 = vrot.slane %v8876_v46, %v9740_v45 }
  0x53   :  { %v183_v29 = vand.u32 4294901760, %v182_v23  ;;  %v190_v30 = vand.u32 4294901760, %v189_v24  ;;  %v197_v31 = vand.u32 4294901760, %v196_v25  ;;  %v671_v60 = vand.u32 4294901760, %v645_v58  ;;  %v654_v23 = vld [vmem:[%s9733_s2 + $0x50] sm:$0xff]  ;;  %v657_v24 = vld [vmem:[%s9733_s2 + $0x68] sm:$0xff] }
  0x54   :  { %v204_v32 = vand.u32 4294901760, %v203_v26  ;;  %8091 = vmatpush3.bf16.msra.mxu1 %v8090_v27  ;;  %v171_v33 = vsub.f32 %v169_v22, %v170_v28  ;;  %v673_v2 = vand.u32 4294901760, %v644_v62  ;;  %v677_v3 = vand.u32 4294901760, %v646_v63 }
  0x55   :  { %v8093_v34 = vpack.c.bf16 %v190_v30, %v183_v29  ;;  %v8908_v7 = vpack.c.bf16 %v675_v61, %v671_v60  ;;  %v8910_v8 = vsub.f32 %v645_v58, %v671_v60  ;;  %v8912_v9 = vsub.f32 %v647_v59, %v675_v61  ;;  %v659_v29 = vld [vmem:[%s9733_s2 + $0x78] sm:$0xff]  ;;  %v656_v30 = vld [vmem:[%s9733_s2 + $0x60] sm:$0xff] }
  0x56   :  { %v172_v35 = vand.u32 4294901760, %v171_v33  ;;  %v8096_v36 = vpack.c.bf16 %v204_v32, %v197_v31  ;;  %v679_v10 = vand.u32 4294901760, %v649_v4  ;;  %v8923_v14 = vpack.c.bf16 %v677_v3, %v673_v2  ;;  %v658_v31 = vld [vmem:[%s9733_s2 + $0x70] sm:$0xff] }
  0x57   :  { %8094 = vmatpush3.bf16.msra.mxu0 %v8093_v34  ;;  %v8925_v15 = vsub.f32 %v644_v62, %v673_v2  ;;  %8123 = vmatprep.subr.bf16.mxu1 %v8908_v7  ;;  %v681_v20 = vand.u32 4294901760, %v648_v6  ;;  %v685_v21 = vand.u32 4294901760, %v650_v11  ;;  %v701_v43 = vand.u32 4294901760, %v658_v31 }
  0x58   :  { %8095 = vmatprep.subr.bf16.mxu0 %v9741_v0  ;;  %7453 = vmatmul.mubr.f32.vlgmr.msra.gmra.mrb[0].mxu1 %v172_v35  ;;  %v8933_v19 = vsub.f32 %v649_v4, %v679_v10  ;;  %vm1773_vm5 = vcmask 64512   ;;  %vm3160_vm6 = vcmask 261248   ;;  %vm4081_vm7 = vcmask 392448  }
  0x59   :  { %751 = vmatprep.mubr.f32.mxu1 %v8730_v1  ;;  %8125 = vmatpush1.bf16.msra.mxu1 %v8923_v14  ;;  %v8955_v32 = vpack.c.bf16 %v685_v21, %v681_v20  ;;  %v8957_v33 = vsub.f32 %v648_v6, %v681_v20  ;;  %v8959_v34 = vsub.f32 %v650_v11, %v685_v21  ;;  %v771_v62 = vand.u32 4294901760, %v8925_v15 }
  0x5a   :  { %vm5006_vm8 = vcmask 523648   ;;  %vm7143_vm11 = vcmask 392320  }
  0x5b   :  { %8097 = vmatpush3.bf16.msra.mxu0 %v8096_v36 }
  0x5c   :  { %8098 = vmatprep.subr.bf16.mxu0 %v9741_v0 }
  0x5e   :  { %7464 = vmatmul.mubr.f32.vlgmr.msra.gmra.mrb[0].mxu0 %v168_v16 }
  0x5f   :  { %8100 = vmatpush3.bf16.msra.mxu0 %v8099_v37  ;;  %7474 = vmatprep.mubr.msk.f32.mxu0 %vm8729_vm0, %v8730_v1 }
  0x60   :  { %8101 = vmatprep.subr.bf16.mxu0 %v9741_v0 }
  0x63   :  { %8103 = vmatpush3.bf16.msra.mxu0 %v8102_v38  ;;  %v693_v38 = vand.u32 4294901760, %v654_v23 }
  0x64   :  { %8104 = vmatprep.subr.bf16.mxu0 %v9741_v0 }
  0x66   :  { %7475 = vmatmul.mubr.f32.vlgmr.msra.gmra.mrb[0].mxu0 %v169_v22  ;;  %v687_v22 = vand.u32 4294901760, %v653_v12 }
  0x67   :  { %8106 = vmatpush3.bf16.msra.mxu0 %v8087_v17  ;;  %7485 = vmatprep.mubr.msk.f32.mxu0 %vm8729_vm0, %v8730_v1 }
  0x68   :  { %8107 = vmatprep.subr.bf16.mxu0 %v9741_v0  ;;  %v8961_v35 = vsub.f32 %v653_v12, %v687_v22  ;;  %v795_v12 = vand.u32 4294901760, %v8957_v33 }
  0x6a   :  { %v796_v21 = vsub.f32 %v8957_v33, %v795_v12 }
  0x6b   :  { %8109 = vmatpush3.bf16.msra.mxu0 %v8090_v27 }
  0x6c   :  { %8110 = vmatprep.subr.bf16.mxu0 %v9741_v0 }
  0x6e   :  { %7486 = vmatmul.mubr.f32.vlgmr.msra.gmra.mrb[0].mxu0 %v170_v28  ;;  %v689_v28 = vand.u32 4294901760, %v652_v18 }
  0x6f   :  { %8112 = vmatpush3.bf16.msra.mxu0 %v8111_v39  ;;  %7496 = vmatprep.mubr.msk.f32.mxu0 %vm8729_vm0, %v8730_v1 }
  0x70   :  { %8113 = vmatprep.subr.bf16.mxu0 %v9741_v0  ;;  %v8968_v39 = vsub.f32 %v652_v18, %v689_v28 }
  0x73   :  { %8115 = vmatpush3.bf16.msra.mxu0 %v8114_v40  ;;  %v695_v40 = vand.u32 4294901760, %v657_v24 }
  0x74   :  { %8116 = vmatprep.subr.bf16.mxu0 %v9741_v0 }
  0x76   :  { %7497 = vmatmul.mubr.f32.vlgmr.msra.gmra.mrb[0].mxu0 %v168_v16 }
  0x77   :  { %8118 = vmatpush3.bf16.msra.mxu0 %v8087_v17  ;;  %7507 = vmatprep.mubr.msk.f32.mxu0 %vm8729_vm0, %v8730_v1  ;;  %v683_v17 = vand.u32 4294901760, %v651_v5 }
  0x78   :  { %8119 = vmatprep.subr.bf16.mxu0 %v9741_v0 }
  0x79   :  { %v8942_v25 = vpack.c.bf16 %v683_v17, %v679_v10  ;;  %v8944_v26 = vsub.f32 %v651_v5, %v683_v17  ;;  %v789_v10 = vand.u32 4294901760, %v8933_v19 }
  0x7b   :  { %8121 = vmatpush3.bf16.msra.mxu0 %v8090_v27  ;;  %v691_v27 = vand.u32 4294901760, %v655_v13  ;;  %8127 = vmatprep.subr.bf16.mxu1 %v8942_v25  ;;  %v801_v11 = vand.u32 4294901760, %v8944_v26  ;;  %v790_v18 = vsub.f32 %v8933_v19, %v789_v10 }
  0x7c   :  { %7515 = vmatprep.subr.mxu0 %v8730_v1  ;;  %8129 = vmatpush1.bf16.msra.mxu1 %v8955_v32 }
  0x7d   :  { %v8964_v36 = vpack.c.bf16 %v691_v27, %v687_v22  ;;  %v8966_v37 = vsub.f32 %v655_v13, %v691_v27  ;;  %v807_v13 = vand.u32 4294901760, %v8959_v34  ;;  %v802_v20 = vsub.f32 %v8944_v26, %v801_v11 }
  0x7e   :  { %7508 = vmatmul.mubr.f32.vlgmr.msra.gmra.mrb[0].mxu0 %v168_v16  ;;  %v8927_v16 = vsub.f32 %v646_v63, %v677_v3  ;;  %v772_v3 = vsub.f32 %v8925_v15, %v771_v62  ;;  %v813_v27 = vand.u32 4294901760, %v8961_v35 }
  0x7f   :  { %7517 = vmatprep.mubr.msk.f32.mxu0 %vm8729_vm0, %v8730_v1  ;;  %8131 = vmatprep.subr.bf16.mxu1 %v8964_v36  ;;  %v808_v22 = vsub.f32 %v8959_v34, %v807_v13 }
  0x80   :  { %v783_v63 = vand.u32 4294901760, %v8927_v16  ;;  %v773_v5 = vand.u32 4294901760, %v772_v3 }
  0x82   :  { %v784_v4 = vsub.f32 %v8927_v16, %v783_v63  ;;  %v9071_v0 = vpack.c.bf16 %v783_v63, %v771_v62 }
  0x84   :  { %v785_v6 = vand.u32 4294901760, %v784_v4 }
  0x86   :  { %v9011_v17 = vpack.c.bf16 %v785_v6, %v773_v5 }
 0x12b   :  { %v174_v41 = vpop.f32.mrb[0].mxu1 }
 0x12c   :  { %v7454_v42 = vpop.f32.mrb[1].mxu1  ;;  %v175_v48 = vadd.f32 %v174_v41, %v94_v47  ;;  %v699_v41 = vand.u32 4294901760, %v659_v29  ;;  %v8971_v47 = vpack.c.bf16 %v693_v38, %v689_v28  ;;  %v825_v28 = vand.u32 4294901760, %v8966_v37 }
 0x12d   :  { %v697_v42 = vand.u32 4294901760, %v656_v30 }
 0x12e   :  { %8133 = vmatpush1.bf16.msra.mxu1 %v8971_v47 }
 0x12f   :  { %v8994_v59 = vpack.c.bf16 %v701_v43, %v697_v42 }
 0x151   :  { %v580_v49 = vpop.f32.mrb[0].mxu0 }
 0x152   :  { %v8417_v50 = vadd.f32 %v580_v49, %v175_v48  ;;  %v7509_v51 = vpop.f32.mrb[1].mxu0  ;;  %v8973_v48 = vsub.f32 %v654_v23, %v693_v38  ;;  %v765_v49 = vand.u32 4294901760, %v8910_v8  ;;  %v791_v23 = vand.u32 4294901760, %v790_v18 }
 0x153   :  { %v8978_v51 = vpack.c.bf16 %v699_v41, %v695_v40 }
 0x154   :  { %v585_v52 = vsel %vm584_vm2, %v8417_v50, 0.0  ;;  %v831_v38 = vand.u32 4294901760, %v8973_v48 }
 0x155   :  { %586 = vadd.xlane.f32.xlu0 %v585_v52  ;;  %v8980_v52 = vsub.f32 %v657_v24, %v695_v40  ;;  %8135 = vmatprep.subr.bf16.mxu1 %v8978_v51  ;;  %v803_v24 = vand.u32 4294901760, %v802_v20 }
 0x156   :  { %8137 = vmatpush1.bf16.msra.mxu1 %v8994_v59 }
 0x157   :  { %v9021_v40 = vpack.c.bf16 %v803_v24, %v791_v23 }
 0x1e2   :  { %v587_v53 = vpop.xlane.xlu0 %586 }
 0x1e3   :  { %v589_v54 = vmul.f32 0.015625, %v587_v53  ;;  %v8982_v53 = vsub.f32 %v659_v29, %v699_v41  ;;  %v797_v29 = vand.u32 4294901760, %v796_v21  ;;  %v814_v41 = vsub.f32 %v8961_v35, %v813_v27 }
 0x1e5   :  { %v8882_v55 = vsub.f32 %v8417_v50, %v589_v54  ;;  %v777_v50 = vand.u32 4294901760, %v8912_v9  ;;  %v8984_v54 = vsub.f32 %v656_v30, %v697_v42  ;;  %v809_v30 = vand.u32 4294901760, %v808_v22 }
 0x1e6   :  { %v826_v42 = vsub.f32 %v8966_v37, %v825_v28  ;;  %v849_v3 = vand.u32 4294901760, %v8982_v53 }
 0x1e7   :  { %v591_v56 = vmul.f32 %v8882_v55, %v8882_v55  ;;  %v778_v58 = vsub.f32 %v8912_v9, %v777_v50  ;;  %v843_v6 = vand.u32 4294901760, %v8984_v54 }
 0x1e8   :  { %v850_v22 = vsub.f32 %v8982_v53, %v849_v3 }
 0x1e9   :  { %v592_v57 = vsel %vm584_vm2, %v591_v56, 0.0  ;;  %v8986_v56 = vsub.f32 %v658_v31, %v701_v43  ;;  %v779_v61 = vand.u32 4294901760, %v778_v58  ;;  %v819_v31 = vand.u32 4294901760, %v8968_v39 }
 0x1ea   :  { %593 = vadd.xlane.f32.xlu0 %v592_v57  ;;  %v766_v57 = vsub.f32 %v8910_v8, %v765_v49  ;;  %v9025_v43 = vpack.c.bf16 %v809_v30, %v797_v29  ;;  %v832_v58 = vsub.f32 %v8973_v48, %v831_v38  ;;  %v844_v24 = vsub.f32 %v8984_v54, %v843_v6 }
 0x1eb   :  { %v855_v18 = vand.u32 4294901760, %v8986_v56 }
 0x1ec   :  { %v767_v60 = vand.u32 4294901760, %v766_v57  ;;  %v820_v57 = vsub.f32 %v8968_v39, %v819_v31  ;;  %v833_v5 = vand.u32 4294901760, %v832_v58 }
 0x1ed   :  { %v856_v29 = vsub.f32 %v8986_v56, %v855_v18 }
 0x1ee   :  { %v8138_v2 = vpack.c.bf16 %v779_v61, %v767_v60  ;;  %v815_v60 = vand.u32 4294901760, %v814_v41  ;;  %v827_v61 = vand.u32 4294901760, %v826_v42  ;;  %v821_v4 = vand.u32 4294901760, %v820_v57 }
 0x1ef   :  { %v851_v41 = vand.u32 4294901760, %v850_v22  ;;  %v845_v42 = vand.u32 4294901760, %v844_v24  ;;  %v857_v57 = vand.u32 4294901760, %v856_v29  ;;  %v9743_v24 = vsub.s32 1, %v8870_v44 }
 0x1f0   :  { %8139 = vmatprep.subr.bf16.mxu1 %v8138_v2  ;;  %v837_v2 = vand.u32 4294901760, %v8980_v52  ;;  %v9033_v20 = vpack.c.bf16 %v827_v61, %v815_v60  ;;  %v9037_v23 = vpack.c.bf16 %v833_v5, %v821_v4  ;;  %v9074_v22 = vpack.c.bf16 %v801_v11, %v789_v10 }
 0x1f1   :  { %v9043_v45 = vpack.c.bf16 %v857_v57, %v845_v42  ;;  %v9065_v57 = vpack.c.bf16 %v777_v50, %v765_v49  ;;  %v9076_v29 = vpack.c.bf16 %v807_v13, %v795_v12  ;;  %v9082_v49 = vpack.c.bf16 %v825_v28, %v813_v27 }
 0x1f2   :  { %v838_v21 = vsub.f32 %v8980_v52, %v837_v2  ;;  %v9090_v11 = vpack.c.bf16 %v849_v3, %v837_v2  ;;  %v9092_v12 = vpack.c.bf16 %v855_v18, %v843_v6 }
 0x1f4   :  { %v839_v30 = vand.u32 4294901760, %v838_v21 }
 0x1f6   :  { %v9041_v58 = vpack.c.bf16 %v851_v41, %v839_v30 }
 0x277   :  { %v594_v30 = vpop.xlane.xlu0 %593 }
 0x278   :  { %v595_v41 = vmul.f32 0.015625, %v594_v30  ;;  %v9744_v30 = vsub.s32 2, %v8870_v44 }
 0x27a   :  { %v596_v42 = vadd.f32 0.0001, %v595_v41  ;;  %v602_v41 = vrot.slane %v8876_v46, %v9743_v24  ;;  %v607_v62 = vrot.slane %v8876_v46, %v9744_v30 }
 0x27c   :  { %8578 = vrsqrt.f32 %v596_v42  ;;  %v9084_v42 = vpack.c.bf16 %v831_v38, %v819_v31 }
 0x286   :  { %v8579_v50 = vpop.eup %8578 }
 0x287   :  { %v598_v63 = vmul.f32 %v8579_v50, %v8882_v55 }
 0x289   :  { %v603_v10 = vmul.f32 %v602_v41, %v598_v63 }
 0x28b   :  { %v608_v13 = vadd.f32 %v607_v62, %v603_v10 }
 0x28d   :  { %v609_v21 = vsel %vm584_vm2, %v608_v13, 0.0 }
 0x28e   :  { %v610_v24 = vrot.slane %v609_v21, 4 }
 0x290   :  { %v611_v27 = vadd.f32 %v610_v24, %v609_v21  ;;  %v9097_v21 = vsub.s32 3, %v8870_v44  ;;  %v638_v24 = vsub.s32 4, %v8870_v44 }
 0x292   :  { %v612_v28 = vrot.slane %v611_v27, 2 }
 0x294   :  { %v613_v5 = vadd.f32 %v612_v28, %v611_v27 }
 0x296   :  { %v614_v31 = vrot.slane %v613_v5, 1 }
 0x298   :  { %v615_v38 = vadd.f32 %v614_v31, %v613_v5 }
 0x29a   :  { %v617_v4 = vmul.f32 0.125, %v615_v38 }
 0x29c   :  { %v618_v61 = vsub.f32 %v608_v13, %v617_v4  ;;  %v634_v4 = vrot.slane %v8876_v46, %v9097_v21 }
 0x29e   :  { %v619_v60 = vmul.f32 %v618_v61, %v618_v61 }
 0x2a0   :  { %v620_v30 = vsel %vm584_vm2, %v619_v60, 0.0  ;;  %v639_v60 = vrot.slane %v8876_v46, %v638_v24  ;;  %v9745_v46 = vpack.c.bf16 %v8912_v9, %v8910_v8  ;;  %v9750_v8 = vpack.c.bf16 %v8973_v48, %v8968_v39 }
 0x2a1   :  { %v621_v55 = vrot.slane %v620_v30, 4  ;;  %v9751_v9 = vpack.c.bf16 %v8982_v53, %v8980_v52 }
 0x2a3   :  { %v622_v41 = vadd.f32 %v621_v55, %v620_v30 }
 0x2a5   :  { %v623_v2 = vrot.slane %v622_v41, 2 }
 0x2a7   :  { %v624_v3 = vadd.f32 %v623_v2, %v622_v41 }
 0x2a9   :  { %v625_v6 = vrot.slane %v624_v3, 1 }
 0x2ab   :  { %v626_v18 = vadd.f32 %v625_v6, %v624_v3 }
 0x2ad   :  { %v627_v50 = vmul.f32 0.125, %v626_v18 }
 0x2af   :  { %v628_v62 = vadd.f32 0.0001, %v627_v50 }
 0x2b1   :  { %8580 = vrsqrt.f32 %v628_v62 }
 0x2bb   :  { %v8581_v5 = vpop.eup %8580 }
 0x2bc   :  { %v630_v63 = vmul.f32 %v8581_v5, %v618_v61 }
 0x2be   :  { %v635_v30 = vmul.f32 %v634_v4, %v630_v63 }
 0x2c0   :  { %v640_v10 = vadd.f32 %v639_v60, %v635_v30 }
 0x2c2   :  { %vm641_vm3 = vcmp.ge.f32.partialorder %v640_v10, 0.0  ;;  %v642_v13 = vmul.f32 0.01, %v640_v10 }
 0x2c4   :  { %v643_v27 = vsel %vm641_vm3, %v640_v10, %v642_v13 }
 0x2c5   :  { %v669_v28 = vsel %vm584_vm2, %v643_v27, 0 }
 0x2c6   :  { %v752_v31 = vand.u32 4294901760, %v669_v28 }
 0x2c8   :  { %v753_v38 = vsub.f32 %v669_v28, %v752_v31 }
 0x2ca   :  { %v754_v55 = vand.u32 4294901760, %v753_v38 }
 0x2cc   :  { %v755_v41 = vsub.f32 %v753_v38, %v754_v55 }
 0x2ce   :  { %v756_v2 = vand.u32 4294901760, %v755_v41 }
 0x2d0   :  { %757 = vmatmul.mubr.f32.vlgmr.msra.gmra.mrb[2].mxu1 %v756_v2 }
 0x2d1   :  { %8141 = vmatpush1.bf16.msra.mxu1 %v9011_v17  ;;  %907 = vmatprep.mubr.f32.mxu1 %v8730_v1  ;;  %v9746_v17 = vpack.c.bf16 %v8927_v16, %v8925_v15  ;;  %v9752_v15 = vpack.c.bf16 %v8986_v56, %v8984_v54 }
 0x2d2   :  { %8143 = vmatprep.subr.bf16.mxu1 %v9021_v40  ;;  %v9747_v40 = vpack.c.bf16 %v8944_v26, %v8933_v19 }
 0x2d5   :  { %8145 = vmatpush1.bf16.msra.mxu1 %v9025_v43  ;;  %v9748_v43 = vpack.c.bf16 %v8959_v34, %v8957_v33 }
 0x2d6   :  { %8147 = vmatprep.subr.bf16.mxu1 %v9033_v20 }
 0x2d9   :  { %8149 = vmatpush1.bf16.msra.mxu1 %v9037_v23 }
 0x2da   :  { %8151 = vmatprep.subr.bf16.mxu1 %v9041_v58 }
 0x2dd   :  { %8153 = vmatpush1.bf16.msra.mxu1 %v9043_v45  ;;  %v9749_v45 = vpack.c.bf16 %v8966_v37, %v8961_v35 }
 0x2de   :  { %8155 = vmatprep.subr.bf16.mxu1 %v9745_v46 }
 0x2e0   :  { %909 = vmatmul.mubr.f32.vlgmr.msra.gmra.mrb[2].mxu1 %v752_v31 }
 0x2e1   :  { %8157 = vmatpush1.bf16.msra.mxu1 %v9746_v17  ;;  %1011 = vmatprep.mubr.f32.mxu1 %v8730_v1 }
 0x2e2   :  { %8159 = vmatprep.subr.bf16.mxu1 %v9747_v40 }
 0x2e5   :  { %8161 = vmatpush1.bf16.msra.mxu1 %v9748_v43 }
 0x2e6   :  { %8163 = vmatprep.subr.bf16.mxu1 %v9749_v45 }
 0x2e9   :  { %8165 = vmatpush1.bf16.msra.mxu1 %v9750_v8 }
 0x2ea   :  { %8167 = vmatprep.subr.bf16.mxu1 %v9751_v9 }
 0x2ed   :  { %8169 = vmatpush1.bf16.msra.mxu1 %v9752_v15 }
 0x2ee   :  { %8171 = vmatprep.subr.bf16.mxu1 %v8908_v7 }
 0x2f0   :  { %1014 = vmatmul.mubr.f32.vlgmr.msra.gmra.mrb[2].mxu1 %v753_v38 }
 0x2f1   :  { %8173 = vmatpush1.bf16.msra.mxu1 %v8923_v14  ;;  %1100 = vmatprep.mubr.f32.mxu1 %v8730_v1 }
 0x2f2   :  { %8175 = vmatprep.subr.bf16.mxu1 %v8942_v25 }
 0x2f5   :  { %8177 = vmatpush1.bf16.msra.mxu1 %v8955_v32 }
 0x2f6   :  { %8179 = vmatprep.subr.bf16.mxu1 %v8964_v36 }
 0x2f9   :  { %8181 = vmatpush1.bf16.msra.mxu1 %v8971_v47 }
 0x2fa   :  { %8183 = vmatprep.subr.bf16.mxu1 %v8978_v51 }
 0x2fd   :  { %8185 = vmatpush1.bf16.msra.mxu1 %v8994_v59 }
 0x2fe   :  { %8187 = vmatprep.subr.bf16.mxu1 %v9065_v57 }
 0x300   :  { %1104 = vmatmul.mubr.f32.vlgmr.msra.gmra.mrb[2].mxu1 %v754_v55 }
 0x301   :  { %8189 = vmatpush1.bf16.msra.mxu1 %v9071_v0  ;;  %1222 = vmatprep.mubr.f32.mxu1 %v8730_v1  ;;  %v85_v0 = vld [vmem:[%s9738_s7 + $0x10] sm:$0x3f] }
 0x302   :  { %8191 = vmatprep.subr.bf16.mxu1 %v9074_v22 }
 0x305   :  { %8193 = vmatpush1.bf16.msra.mxu1 %v9076_v29 }
 0x306   :  { %8195 = vmatprep.subr.bf16.mxu1 %v9082_v49 }
 0x309   :  { %8197 = vmatpush1.bf16.msra.mxu1 %v9084_v42  ;;  %v86_v42 = vld [vmem:[%s9738_s7 + $0x18] sm:$0x3f] }
 0x30a   :  { %8199 = vmatprep.subr.bf16.mxu1 %v9090_v11  ;;  %v667_v11 = vrot.slane %v86_v42, %v9097_v21  ;;  %v9753_v42 = vmov 0.0|0.0  }
 0x30d   :  { %8201 = vmatpush1.bf16.msra.mxu1 %v9092_v12 }
 0x30e   :  { %8203 = vmatprep.subr.bf16.mxu1 %v8908_v7  ;;  %v663_v7 = vrot.slane %v85_v0, %v9097_v21 }
 0x310   :  { %1224 = vmatmul.mubr.f32.vlgmr.msra.gmra.mrb[2].mxu1 %v752_v31 }
 0x311   :  { %8205 = vmatpush1.bf16.msra.mxu1 %v8923_v14  ;;  %1310 = vmatprep.mubr.f32.mxu1 %v8730_v1 }
 0x312   :  { %8207 = vmatprep.subr.bf16.mxu1 %v8942_v25 }
 0x315   :  { %8209 = vmatpush1.bf16.msra.mxu1 %v8955_v32 }
 0x316   :  { %8211 = vmatprep.subr.bf16.mxu1 %v8964_v36 }
 0x319   :  { %8213 = vmatpush1.bf16.msra.mxu1 %v8971_v47 }
 0x31a   :  { %8215 = vmatprep.subr.bf16.mxu1 %v8978_v51 }
 0x31d   :  { %8217 = vmatpush1.bf16.msra.mxu1 %v8994_v59 }
 0x31e   :  { %7510 = vmatprep.subr.mxu1 %v8730_v1 }
 0x320   :  { %1312 = vmatmul.mubr.f32.vlgmr.msra.gmra.mrb[2].mxu1 %v752_v31 }
 0x321   :  { %7512 = vmatprep.mubr.msk.f32.mxu1 %vm8729_vm0, %v8730_v1 }
 0x3f3   :  { %v1313_v14 = vpop.f32.mrb[2].mxu1 }
 0x3f4   :  { %v9173_v16 = vadd.f32 %v1313_v14, %v663_v7  ;;  %v9175_v19 = vpop.f32.mrb[3].mxu1 }
 0x3f5   :  { %v9215_v12 = vadd.f32 %v9175_v19, %v667_v11 }
 0x3f6   :  { %1319 = vrot.lane.b32.xlu1 %v9173_v16, %s8731_s17  ;;  %v1322_v25 = vsel %vm1321_vm4, %v9173_v16, 0 }
 0x3f7   :  { %v1392_v26 = vand.u32 4294901760, %v1322_v25 }
 0x3f9   :  { %v1393_v32 = vsub.f32 %v1322_v25, %v1392_v26 }
 0x3fb   :  { %v1394_v33 = vand.u32 4294901760, %v1393_v32 }
 0x3fd   :  { %v1395_v36 = vsub.f32 %v1393_v32, %v1394_v33 }
 0x3ff   :  { %v1396_v47 = vand.u32 4294901760, %v1395_v36 }
 0x468   :  { %v1320_v34 = vpop.permute.xlu1 %1319 }
 0x469   :  { %v1324_v35 = vsel %vm1321_vm4, %v1320_v34, 0 }
 0x46a   :  { %v1327_v37 = vand.u32 4294901760, %v1324_v35 }
 0x46c   :  { %v1404_v39 = vsub.f32 %v1324_v35, %v1327_v37  ;;  %7511 = vmatpush3.xpose.msra.mxu1 %v1327_v37 }
 0x46d   :  { %7600 = vmatprep.subr.mxu1 %v8730_v1 }
 0x46e   :  { %v1405_v48 = vand.u32 4294901760, %v1404_v39 }
 0x46f   :  { %7513 = vmatmul.mubr.f32.vlgmr.msra.gmra.mrb[4].mxu1 %v1396_v47 }
 0x470   :  { %v1406_v51 = vsub.f32 %v1404_v39, %v1405_v48  ;;  %7602 = vmatprep.mubr.msk.f32.mxu1 %vm8729_vm0, %v8730_v1 }
 0x472   :  { %v1407_v52 = vand.u32 4294901760, %v1406_v51 }
 0x474   :  { %7516 = vmatpush3.xpose.msra.mxu0 %v1407_v52 }
 0x475   :  { %7520 = vmatprep.subr.mxu0 %v8730_v1 }
 0x477   :  { %7518 = vmatmul.mubr.f32.vlgmr.msra.gmra.mrb[2].mxu0 %v1392_v26 }
 0x478   :  { %7521 = vmatpush3.xpose.msra.mxu0 %v1404_v39  ;;  %7522 = vmatprep.mubr.msk.f32.mxu0 %vm8729_vm0, %v8730_v1 }
 0x479   :  { %7525 = vmatprep.subr.mxu0 %v8730_v1 }
 0x47f   :  { %7523 = vmatmul.mubr.f32.vlgmr.msra.gmra.mrb[2].mxu0 %v1393_v32 }
 0x480   :  { %7526 = vmatpush3.xpose.msra.mxu0 %v1327_v37  ;;  %7527 = vmatprep.mubr.msk.f32.mxu0 %vm8729_vm0, %v8730_v1 }
 0x481   :  { %7530 = vmatprep.subr.mxu0 %v8730_v1 }
 0x487   :  { %7528 = vmatmul.mubr.f32.vlgmr.msra.gmra.mrb[2].mxu0 %v1394_v33 }
 0x488   :  { %7531 = vmatpush3.xpose.msra.mxu0 %v1405_v48  ;;  %7532 = vmatprep.mubr.msk.f32.mxu0 %vm8729_vm0, %v8730_v1 }
 0x489   :  { %7535 = vmatprep.subr.mxu0 %v8730_v1 }
 0x48f   :  { %7533 = vmatmul.mubr.f32.vlgmr.msra.gmra.mrb[2].mxu0 %v1392_v26 }
 0x490   :  { %7536 = vmatpush3.xpose.msra.mxu0 %v1327_v37  ;;  %7537 = vmatprep.mubr.msk.f32.mxu0 %vm8729_vm0, %v8730_v1 }
 0x491   :  { %7540 = vmatprep.subr.mxu0 %v8730_v1 }
 0x497   :  { %7538 = vmatmul.mubr.f32.vlgmr.msra.gmra.mrb[2].mxu0 %v1392_v26 }
 0x498   :  { %7542 = vmatprep.mubr.msk.f32.mxu0 %vm8729_vm0, %v8730_v1 }
 0x542   :  { %v1398_v53 = vpop.f32.mrb[4].mxu1 }
 0x543   :  { %v7514_v54 = vpop.f32.mrb[5].mxu1 }
 0x56a   :  { %v1768_v56 = vpop.f32.mrb[2].mxu0 }
 0x56b   :  { %v8420_v59 = vadd.f32 %v1768_v56, %v1398_v53  ;;  %v7539_v20 = vpop.f32.mrb[3].mxu0 }
 0x56d   :  { %v1772_v23 = vmul.f32 0.25, %v8420_v59 }
 0x56f   :  { %v1774_v58 = vsel %vm1773_vm5, %v1772_v23, -inf }
 0x570   :  { %1775 = vmax.xlane.f32.xlu1 %v1774_v58 }
 0x581   :  { %3162 = vrot.lane.b32.xlu1 %v9173_v16, %s8732_s18 }
 0x5fd   :  { %v1776_v61 = vpop.xlane.xlu1 %1775 }
 0x5fe   :  { %v1777_v22 = vsub.f32 %v1772_v23, %v1776_v61 }
 0x600   :  { %v1778_v29 = vmul.f32 1.442695, %v1777_v22 }
 0x601   :  { %v3163_v7 = vpop.permute.xlu1 %3162 }
 0x602   :  { %8582 = vpow2.f32 %v1778_v29  ;;  %v3166_v19 = vsel %vm1321_vm4, %v3163_v7, 0 }
 0x603   :  { %v3236_v26 = vand.u32 4294901760, %v3166_v19 }
 0x605   :  { %v3237_v33 = vsub.f32 %v3166_v19, %v3236_v26 }
 0x607   :  { %v3238_v35 = vand.u32 4294901760, %v3237_v33 }
 0x609   :  { %v3239_v37 = vsub.f32 %v3237_v33, %v3238_v35 }
 0x60b   :  { %v3240_v47 = vand.u32 4294901760, %v3239_v37 }
 0x60c   :  { %v8583_v57 = vpop.eup %8582 }
 0x60d   :  { %v1780_v49 = vsel %vm1773_vm5, %v8583_v57, 0.0 }
 0x60e   :  { %1781 = vadd.xlane.f32.xlu0 %v1780_v49 }
 0x624   :  { %1785 = vrot.lane.b32.xlu0 %v9173_v16, %s8733_s19 }
 0x628   :  { %2238 = vrot.lane.b32.xlu0 %v9173_v16, %s8734_s0 }
 0x62c   :  { %2240 = vrot.lane.b32.xlu0 %v9173_v16, %s8735_s23 }
 0x630   :  { %3164 = vrot.lane.b32.xlu0 %v9173_v16, %s8736_s24 }
 0x634   :  { %4084 = vrot.lane.b32.xlu0 %v9215_v12, %s8731_s17 }
 0x638   :  { %4086 = vrot.lane.b32.xlu0 %v9215_v12, %s8733_s19 }
 0x69b   :  { %v1782_v3 = vpop.xlane.xlu0 %1781 }
 0x69c   :  { %8584 = vrcp.f32 %v1782_v3 }
 0x69f   :  { %v1786_v6 = vpop.permute.xlu0 %1785 }
 0x6a0   :  { %v1792_v18 = vand.u32 4294901760, %v1786_v6 }
 0x6a2   :  { %7541 = vmatpush3.msra.mxu0 %v1792_v18  ;;  %v1869_v21 = vsub.f32 %v1786_v6, %v1792_v18 }
 0x6a3   :  { %7545 = vmatprep.subr.mxu0 %v8730_v1  ;;  %v2239_v31 = vpop.permute.xlu0 %2238 }
 0x6a4   :  { %v1870_v63 = vand.u32 4294901760, %v1869_v21  ;;  %v2242_v55 = vsel %vm1321_vm4, %v2239_v31, 0 }
 0x6a5   :  { %v2312_v2 = vand.u32 4294901760, %v2242_v55 }
 0x6a6   :  { %v8585_v50 = vpop.eup %8584  ;;  %v1871_v10 = vsub.f32 %v1869_v21, %v1870_v63 }
 0x6a7   :  { %v1784_v62 = vmul.f32 %v8585_v50, %v8583_v57  ;;  %v2241_v38 = vpop.permute.xlu0 %2240  ;;  %v2313_v17 = vsub.f32 %v2242_v55, %v2312_v2 }
 0x6a8   :  { %v1872_v28 = vand.u32 4294901760, %v1871_v10  ;;  %v2244_v41 = vsel %vm1321_vm4, %v2241_v38, 0 }
 0x6a9   :  { %v1789_v4 = vsel %vm1773_vm5, %v1784_v62, 0  ;;  %v2247_v46 = vand.u32 4294901760, %v2244_v41  ;;  %v2314_v43 = vand.u32 4294901760, %v2313_v17 }
 0x6aa   :  { %v1857_v5 = vand.u32 4294901760, %v1789_v4 }
 0x6ab   :  { %v2324_v40 = vsub.f32 %v2244_v41, %v2247_v46  ;;  %v2315_v8 = vsub.f32 %v2313_v17, %v2314_v43  ;;  %v3165_v14 = vpop.permute.xlu0 %3164 }
 0x6ac   :  { %v1858_v60 = vsub.f32 %v1789_v4, %v1857_v5  ;;  %v3168_v25 = vsel %vm1321_vm4, %v3165_v14, 0 }
 0x6ad   :  { %v2325_v45 = vand.u32 4294901760, %v2324_v40  ;;  %v2316_v15 = vand.u32 4294901760, %v2315_v8  ;;  %v3171_v32 = vand.u32 4294901760, %v3168_v25 }
 0x6ae   :  { %v1859_v30 = vand.u32 4294901760, %v1858_v60 }
 0x6af   :  { %v2326_v9 = vsub.f32 %v2324_v40, %v2325_v45  ;;  %v3248_v34 = vsub.f32 %v3168_v25, %v3171_v32  ;;  %v4085_v51 = vpop.permute.xlu0 %4084 }
 0x6b0   :  { %v1860_v13 = vsub.f32 %v1858_v60, %v1859_v30  ;;  %v4088_v53 = vsel %vm1321_vm4, %v4085_v51, 0  ;;  %v3632_v51 = vand.u32 4294901760, %v9215_v12 }
 0x6b1   :  { %v2327_v0 = vand.u32 4294901760, %v2326_v9  ;;  %v3249_v36 = vand.u32 4294901760, %v3248_v34  ;;  %v4158_v56 = vand.u32 4294901760, %v4088_v53 }
 0x6b2   :  { %v1861_v27 = vand.u32 4294901760, %v1860_v13 }
 0x6b3   :  { %v3250_v39 = vsub.f32 %v3248_v34, %v3249_v36  ;;  %v4087_v52 = vpop.permute.xlu0 %4086  ;;  %v4159_v20 = vsub.f32 %v4088_v53, %v4158_v56 }
 0x6b4   :  { %7543 = vmatmul.mubr.f32.vlgmr.msra.gmra.mrb[4].mxu0 %v1861_v27  ;;  %v4090_v54 = vsel %vm1321_vm4, %v4087_v52, 0 }
 0x6b5   :  { %7546 = vmatpush3.msra.mxu0 %v1872_v28  ;;  %7547 = vmatprep.mubr.msk.f32.mxu0 %vm8729_vm0, %v8730_v1  ;;  %v3251_v48 = vand.u32 4294901760, %v3250_v39  ;;  %v4093_v59 = vand.u32 4294901760, %v4090_v54  ;;  %v4160_v58 = vand.u32 4294901760, %v4159_v20 }
 0x6b6   :  { %7550 = vmatprep.subr.mxu0 %v8730_v1 }
 0x6b7   :  { %v4170_v23 = vsub.f32 %v4090_v54, %v4093_v59  ;;  %v4161_v22 = vsub.f32 %v4159_v20, %v4160_v58  ;;  %v3709_v54 = vsub.f32 %v9215_v12, %v3632_v51 }
 0x6b9   :  { %v4171_v61 = vand.u32 4294901760, %v4170_v23  ;;  %v4162_v57 = vand.u32 4294901760, %v4161_v22 }
 0x6bb   :  { %v4172_v29 = vsub.f32 %v4170_v23, %v4171_v61 }
 0x6bc   :  { %7548 = vmatmul.mubr.f32.vlgmr.msra.gmra.mrb[4].mxu0 %v1857_v5 }
 0x6bd   :  { %7551 = vmatpush3.msra.mxu0 %v1869_v21  ;;  %7552 = vmatprep.mubr.msk.f32.mxu0 %vm8729_vm0, %v8730_v1  ;;  %v4173_v49 = vand.u32 4294901760, %v4172_v29 }
 0x6be   :  { %7555 = vmatprep.subr.mxu0 %v8730_v1 }
 0x6c4   :  { %7553 = vmatmul.mubr.f32.vlgmr.msra.gmra.mrb[4].mxu0 %v1858_v60 }
 0x6c5   :  { %7556 = vmatpush3.msra.mxu0 %v1792_v18  ;;  %7557 = vmatprep.mubr.msk.f32.mxu0 %vm8729_vm0, %v8730_v1 }
 0x6c6   :  { %7560 = vmatprep.subr.mxu0 %v8730_v1 }
 0x6cc   :  { %7558 = vmatmul.mubr.f32.vlgmr.msra.gmra.mrb[4].mxu0 %v1859_v30 }
 0x6cd   :  { %7561 = vmatpush3.msra.mxu0 %v1870_v63  ;;  %7562 = vmatprep.mubr.msk.f32.mxu0 %vm8729_vm0, %v8730_v1 }
 0x6ce   :  { %7565 = vmatprep.subr.mxu0 %v8730_v1 }
 0x6d4   :  { %7563 = vmatmul.mubr.f32.vlgmr.msra.gmra.mrb[4].mxu0 %v1857_v5 }
 0x6d5   :  { %7566 = vmatpush3.msra.mxu0 %v1792_v18  ;;  %7567 = vmatprep.mubr.msk.f32.mxu0 %vm8729_vm0, %v8730_v1 }
 0x6d6   :  { %7570 = vmatprep.subr.mxu0 %v8730_v1 }
 0x6dc   :  { %7568 = vmatmul.mubr.f32.vlgmr.msra.gmra.mrb[4].mxu0 %v1857_v5 }
 0x6dd   :  { %7571 = vmatpush3.xpose.msra.mxu0 %v2247_v46  ;;  %7572 = vmatprep.mubr.msk.f32.mxu0 %vm8729_vm0, %v8730_v1 }
 0x6de   :  { %7575 = vmatprep.subr.mxu0 %v8730_v1 }
 0x6e0   :  { %7573 = vmatmul.mubr.f32.vlgmr.msra.gmra.mrb[6].mxu0 %v2316_v15 }
 0x6e1   :  { %7576 = vmatpush3.xpose.msra.mxu0 %v2327_v0  ;;  %7577 = vmatprep.mubr.msk.f32.mxu0 %vm8729_vm0, %v8730_v1 }
 0x6e2   :  { %7580 = vmatprep.subr.mxu0 %v8730_v1 }
 0x6e8   :  { %7578 = vmatmul.mubr.f32.vlgmr.msra.gmra.mrb[6].mxu0 %v2312_v2 }
 0x6e9   :  { %7581 = vmatpush3.xpose.msra.mxu0 %v2324_v40  ;;  %7582 = vmatprep.mubr.msk.f32.mxu0 %vm8729_vm0, %v8730_v1 }
 0x6ea   :  { %7585 = vmatprep.subr.mxu0 %v8730_v1 }
 0x6f0   :  { %7583 = vmatmul.mubr.f32.vlgmr.msra.gmra.mrb[6].mxu0 %v2313_v17 }
 0x6f1   :  { %7586 = vmatpush3.xpose.msra.mxu0 %v2247_v46  ;;  %7587 = vmatprep.mubr.msk.f32.mxu0 %vm8729_vm0, %v8730_v1 }
 0x6f2   :  { %7590 = vmatprep.subr.mxu0 %v8730_v1 }
 0x6f8   :  { %7588 = vmatmul.mubr.f32.vlgmr.msra.gmra.mrb[6].mxu0 %v2314_v43 }
 0x6f9   :  { %7591 = vmatpush3.xpose.msra.mxu0 %v2325_v45  ;;  %7592 = vmatprep.mubr.msk.f32.mxu0 %vm8729_vm0, %v8730_v1 }
 0x6fa   :  { %7595 = vmatprep.subr.mxu0 %v8730_v1 }
 0x700   :  { %7593 = vmatmul.mubr.f32.vlgmr.msra.gmra.mrb[6].mxu0 %v2312_v2 }
 0x701   :  { %7596 = vmatpush3.xpose.msra.mxu0 %v2247_v46  ;;  %7597 = vmatprep.mubr.msk.f32.mxu0 %vm8729_vm0, %v8730_v1 }
 0x702   :  { %7630 = vmatprep.subr.mxu0 %v8730_v1 }
 0x708   :  { %7598 = vmatmul.mubr.f32.vlgmr.msra.gmra.mrb[6].mxu0 %v2312_v2 }
 0x709   :  { %7631 = vmatpush3.xpose.msra.mxu0 %v3171_v32  ;;  %7632 = vmatprep.mubr.msk.f32.mxu0 %vm8729_vm0, %v8730_v1 }
 0x70a   :  { %7635 = vmatprep.subr.mxu0 %v8730_v1 }
 0x70c   :  { %7633 = vmatmul.mubr.f32.vlgmr.msra.gmra.mrb[8].mxu0 %v3240_v47 }
 0x70d   :  { %7636 = vmatpush3.xpose.msra.mxu0 %v3251_v48  ;;  %7637 = vmatprep.mubr.msk.f32.mxu0 %vm8729_vm0, %v8730_v1 }
 0x70e   :  { %7640 = vmatprep.subr.mxu0 %v8730_v1 }
 0x714   :  { %7638 = vmatmul.mubr.f32.vlgmr.msra.gmra.mrb[8].mxu0 %v3236_v26 }
 0x715   :  { %7641 = vmatpush3.xpose.msra.mxu0 %v3248_v34  ;;  %7642 = vmatprep.mubr.msk.f32.mxu0 %vm8729_vm0, %v8730_v1 }
 0x716   :  { %7645 = vmatprep.subr.mxu0 %v8730_v1 }
 0x71c   :  { %7643 = vmatmul.mubr.f32.vlgmr.msra.gmra.mrb[8].mxu0 %v3237_v33 }
 0x71d   :  { %7646 = vmatpush3.xpose.msra.mxu0 %v3171_v32  ;;  %7647 = vmatprep.mubr.msk.f32.mxu0 %vm8729_vm0, %v8730_v1 }
 0x71e   :  { %7650 = vmatprep.subr.mxu0 %v8730_v1 }
 0x724   :  { %7648 = vmatmul.mubr.f32.vlgmr.msra.gmra.mrb[8].mxu0 %v3238_v35 }
 0x725   :  { %7651 = vmatpush3.xpose.msra.mxu0 %v3249_v36  ;;  %7652 = vmatprep.mubr.msk.f32.mxu0 %vm8729_vm0, %v8730_v1 }
 0x726   :  { %7655 = vmatprep.subr.mxu0 %v8730_v1 }
 0x72c   :  { %7653 = vmatmul.mubr.f32.vlgmr.msra.gmra.mrb[8].mxu0 %v3236_v26 }
 0x72d   :  { %7656 = vmatpush3.xpose.msra.mxu0 %v3171_v32  ;;  %7657 = vmatprep.mubr.msk.f32.mxu0 %vm8729_vm0, %v8730_v1 }
 0x72e   :  { %7690 = vmatprep.subr.mxu0 %v8730_v1 }
 0x734   :  { %7658 = vmatmul.mubr.f32.vlgmr.msra.gmra.mrb[8].mxu0 %v3236_v26 }
 0x735   :  { %7691 = vmatpush3.xpose.msra.mxu0 %v4093_v59  ;;  %7692 = vmatprep.mubr.msk.f32.mxu0 %vm8729_vm0, %v8730_v1 }
 0x736   :  { %7695 = vmatprep.subr.mxu0 %v8730_v1 }
 0x738   :  { %7693 = vmatmul.mubr.f32.vlgmr.msra.gmra.mrb[10].mxu0 %v4162_v57 }
 0x739   :  { %7696 = vmatpush3.xpose.msra.mxu0 %v4173_v49  ;;  %7697 = vmatprep.mubr.msk.f32.mxu0 %vm8729_vm0, %v8730_v1 }
 0x73a   :  { %7700 = vmatprep.subr.mxu0 %v8730_v1 }
 0x740   :  { %7698 = vmatmul.mubr.f32.vlgmr.msra.gmra.mrb[10].mxu0 %v4158_v56 }
 0x741   :  { %7701 = vmatpush3.xpose.msra.mxu0 %v4170_v23  ;;  %7702 = vmatprep.mubr.msk.f32.mxu0 %vm8729_vm0, %v8730_v1 }
 0x742   :  { %7705 = vmatprep.subr.mxu0 %v8730_v1 }
 0x748   :  { %7703 = vmatmul.mubr.f32.vlgmr.msra.gmra.mrb[10].mxu0 %v4159_v20  ;;  %v3710_v20 = vand.u32 4294901760, %v3709_v54 }
 0x749   :  { %7706 = vmatpush3.xpose.msra.mxu0 %v4093_v59  ;;  %7707 = vmatprep.mubr.msk.f32.mxu0 %vm8729_vm0, %v8730_v1 }
 0x74a   :  { %7710 = vmatprep.subr.mxu0 %v8730_v1 }
 0x750   :  { %7708 = vmatmul.mubr.f32.vlgmr.msra.gmra.mrb[10].mxu0 %v4160_v58 }
 0x751   :  { %7711 = vmatpush3.xpose.msra.mxu0 %v4171_v61  ;;  %7712 = vmatprep.mubr.msk.f32.mxu0 %vm8729_vm0, %v8730_v1  ;;  %v3711_v61 = vsub.f32 %v3709_v54, %v3710_v20 }
 0x752   :  { %7715 = vmatprep.subr.mxu0 %v8730_v1 }
 0x753   :  { %v3712_v29 = vand.u32 4294901760, %v3711_v61 }
 0x758   :  { %7713 = vmatmul.mubr.f32.vlgmr.msra.gmra.mrb[10].mxu0 %v4158_v56 }
 0x759   :  { %7716 = vmatpush3.xpose.msra.mxu0 %v4093_v59  ;;  %7717 = vmatprep.mubr.msk.f32.mxu0 %vm8729_vm0, %v8730_v1 }
 0x75a   :  { %8218 = vmatprep.subr.bf16.mxu0 %v9753_v42 }
 0x760   :  { %7718 = vmatmul.mubr.f32.vlgmr.msra.gmra.mrb[10].mxu0 %v4158_v56 }
 0x761   :  { %7766 = vmatprep.mubr.msk.f32.mxu0 %vm8729_vm0, %v8730_v1 }
 0x7af   :  { %v2233_v11 = vpop.f32.mrb[4].mxu0 }
 0x7b0   :  { %2237 = vst.msk [vmem:[#allocation2] sm:$0xff] %vm1321_vm4, %v2233_v11  ;;  %v7569_v3 = vpop.f32.mrb[5].mxu0 }
 0x7db   :  { %v2688_v6 = vpop.f32.mrb[6].mxu0 }
 0x7dc   :  { %v2692_v18 = vmul.f32 0.25, %v2688_v6  ;;  %v7599_v50 = vpop.f32.mrb[7].mxu0 }
 0x7de   :  { %v2693_v62 = vsel %vm1773_vm5, %v2692_v18, -inf }
 0x7df   :  { %2694 = vmax.xlane.f32.xlu0 %v2693_v62 }
 0x807   :  { %v3612_v21 = vpop.f32.mrb[8].mxu0 }
 0x808   :  { %v3616_v4 = vmul.f32 0.25, %v3612_v21  ;;  %v7659_v5 = vpop.f32.mrb[9].mxu0 }
 0x80a   :  { %v3617_v63 = vsel %vm1773_vm5, %v3616_v4, -inf }
 0x80b   :  { %3618 = vmax.xlane.f32.xlu1 %v3617_v63 }
 0x833   :  { %v4534_v60 = vpop.f32.mrb[10].mxu0 }
 0x834   :  { %v7719_v30 = vpop.f32.mrb[11].mxu0  ;;  %v4538_v31 = vmul.f32 0.25, %v4534_v60 }
 0x836   :  { %v4539_v55 = vsel %vm1773_vm5, %v4538_v31, -inf }
 0x86c   :  { %v2695_v10 = vpop.xlane.xlu0 %2694 }
 0x86d   :  { %v2696_v13 = vsub.f32 %v2692_v18, %v2695_v10 }
 0x86f   :  { %v2697_v27 = vmul.f32 1.442695, %v2696_v13 }
 0x871   :  { %8586 = vpow2.f32 %v2697_v27 }
 0x87b   :  { %v8587_v28 = vpop.eup %8586 }
 0x87c   :  { %v2699_v38 = vsel %vm1773_vm5, %v8587_v28, 0.0 }
 0x87d   :  { %2700 = vadd.xlane.f32.xlu0 %v2699_v38 }
 0x881   :  { %4540 = vmax.xlane.f32.xlu0 %v4539_v55  ;;  %v5009_v55 = vld [vmem:[#allocation8] sm:$0xff] }
 0x897   :  { %2704 = vrot.lane.b32.xlu0 %v9173_v16, %s8737_s25 }
 0x898   :  { %v3619_v41 = vpop.xlane.xlu1 %3618 }
 0x899   :  { %v3620_v2 = vsub.f32 %v3616_v4, %v3619_v41  ;;  %v5010_v41 = vld [vmem:[#allocation8 + $0x8] sm:$0xff] }
 0x89b   :  { %v3621_v46 = vmul.f32 1.442695, %v3620_v2  ;;  %v5025_v2 = vand.u32 4294901760, %v5009_v55 }
 0x89d   :  { %8588 = vpow2.f32 %v3621_v46  ;;  %v5028_v46 = vand.u32 4294901760, %v5010_v41 }
 0x8a7   :  { %v8589_v17 = vpop.eup %8588 }
 0x8a8   :  { %v3623_v40 = vsel %vm1773_vm5, %v8589_v17, 0.0 }
 0x8a9   :  { %3624 = vadd.xlane.f32.xlu1 %v3623_v40  ;;  %v5012_v40 = vld [vmem:[#allocation8 + $0x18] sm:$0xff] }
 0x90a   :  { %v2701_v43 = vpop.xlane.xlu0 %2700 }
 0x90b   :  { %8590 = vrcp.f32 %v2701_v43  ;;  %v5013_v43 = vld [vmem:[#allocation8 + $0x20] sm:$0xff] }
 0x90e   :  { %v4541_v45 = vpop.xlane.xlu0 %4540 }
 0x90f   :  { %v4542_v8 = vsub.f32 %v4538_v31, %v4541_v45 }
 0x911   :  { %v4543_v9 = vmul.f32 1.442695, %v4542_v8  ;;  %v5034_v8 = vand.u32 4294901760, %v5012_v40 }
 0x912   :  { %v2705_v15 = vpop.permute.xlu0 %2704 }
 0x913   :  { %8592 = vpow2.f32 %v4543_v9  ;;  %v2711_v0 = vand.u32 4294901760, %v2705_v15  ;;  %v5014_v9 = vld [vmem:[#allocation8 + $0x28] sm:$0xff] }
 0x915   :  { %v8591_v7 = vpop.eup %8590  ;;  %7601 = vmatpush3.msra.mxu1 %v2711_v0  ;;  %v2788_v16 = vsub.f32 %v2705_v15, %v2711_v0  ;;  %v5037_v15 = vand.u32 4294901760, %v5013_v43 }
 0x916   :  { %v2703_v14 = vmul.f32 %v8591_v7, %v8587_v28  ;;  %7605 = vmatprep.subr.mxu1 %v8730_v1  ;;  %v5016_v7 = vld [vmem:[#allocation8 + $0x38] sm:$0xff] }
 0x917   :  { %v2789_v26 = vand.u32 4294901760, %v2788_v16 }
 0x918   :  { %v2708_v19 = vsel %vm1773_vm5, %v2703_v14, 0  ;;  %v9375_v14 = vpack.c.bf16 %v5028_v46, %v5025_v2 }
 0x919   :  { %v2776_v25 = vand.u32 4294901760, %v2708_v19  ;;  %v2790_v35 = vsub.f32 %v2788_v16, %v2789_v26 }
 0x91a   :  { %8220 = vmatpush3.bf16.msra.mxu0 %v9375_v14 }
 0x91b   :  { %v2777_v32 = vsub.f32 %v2708_v19, %v2776_v25  ;;  %v2791_v47 = vand.u32 4294901760, %v2790_v35  ;;  %v9379_v19 = vsub.f32 %v5010_v41, %v5028_v46  ;;  %8221 = vmatprep.subr.bf16.mxu0 %v9753_v42 }
 0x91d   :  { %v9309_v33 = vpop.eup %8592  ;;  %v2778_v34 = vand.u32 4294901760, %v2777_v32 }
 0x91e   :  { %v4545_v36 = vsel %vm1773_vm5, %v9309_v33, 0.0 }
 0x91f   :  { %4546 = vadd.xlane.f32.xlu1 %v4545_v36  ;;  %v2779_v37 = vsub.f32 %v2777_v32, %v2778_v34 }
 0x921   :  { %v2780_v39 = vand.u32 4294901760, %v2779_v37  ;;  %v5046_v37 = vand.u32 4294901760, %v5016_v7 }
 0x923   :  { %7603 = vmatmul.mubr.f32.vlgmr.msra.gmra.mrb[6].mxu1 %v2780_v39 }
 0x924   :  { %7606 = vmatpush3.msra.mxu1 %v2791_v47  ;;  %7607 = vmatprep.mubr.msk.f32.mxu1 %vm8729_vm0, %v8730_v1  ;;  %v9395_v47 = vsub.f32 %v5016_v7, %v5046_v37 }
 0x925   :  { %7610 = vmatprep.subr.mxu1 %v8730_v1 }
 0x92b   :  { %7608 = vmatmul.mubr.f32.vlgmr.msra.gmra.mrb[6].mxu1 %v2776_v25 }
 0x92c   :  { %7611 = vmatpush3.msra.mxu1 %v2788_v16  ;;  %7612 = vmatprep.mubr.msk.f32.mxu1 %vm8729_vm0, %v8730_v1  ;;  %v9377_v16 = vsub.f32 %v5009_v55, %v5025_v2 }
 0x92d   :  { %7615 = vmatprep.subr.mxu1 %v8730_v1 }
 0x930   :  { %4550 = vrot.lane.b32.xlu1 %v9215_v12, %s8734_s0 }
 0x933   :  { %7613 = vmatmul.mubr.f32.vlgmr.msra.gmra.mrb[6].mxu1 %v2777_v32  ;;  %v9383_v32 = vsub.f32 %v5012_v40, %v5034_v8 }
 0x934   :  { %7616 = vmatpush3.msra.mxu1 %v2711_v0  ;;  %7617 = vmatprep.mubr.msk.f32.mxu1 %vm8729_vm0, %v8730_v1 }
 0x935   :  { %7620 = vmatprep.subr.mxu1 %v8730_v1 }
 0x936   :  { %v3625_v48 = vpop.xlane.xlu1 %3624 }
 0x937   :  { %8594 = vrcp.f32 %v3625_v48 }
 0x93b   :  { %7618 = vmatmul.mubr.f32.vlgmr.msra.gmra.mrb[6].mxu1 %v2778_v34 }
 0x93c   :  { %7621 = vmatpush3.msra.mxu1 %v2789_v26  ;;  %7622 = vmatprep.mubr.msk.f32.mxu1 %vm8729_vm0, %v8730_v1 }
 0x93d   :  { %7625 = vmatprep.subr.mxu1 %v8730_v1 }
 0x941   :  { %v8595_v52 = vpop.eup %8594 }
 0x942   :  { %v3627_v53 = vmul.f32 %v8595_v52, %v8589_v17  ;;  %v5011_v17 = vld [vmem:[#allocation8 + $0x10] sm:$0xff] }
 0x943   :  { %7623 = vmatmul.mubr.f32.vlgmr.msra.gmra.mrb[6].mxu1 %v2776_v25  ;;  %v5031_v45 = vand.u32 4294901760, %v5011_v17 }
 0x944   :  { %7626 = vmatpush3.msra.mxu1 %v2711_v0  ;;  %7627 = vmatprep.mubr.msk.f32.mxu1 %vm8729_vm0, %v8730_v1  ;;  %v3629_v56 = vsel %vm1773_vm5, %v3627_v53, 0  ;;  %v5015_v0 = vld [vmem:[#allocation8 + $0x30] sm:$0xff] }
 0x945   :  { %7660 = vmatprep.subr.mxu1 %v8730_v1  ;;  %v3697_v59 = vand.u32 4294901760, %v3629_v56  ;;  %v9381_v26 = vsub.f32 %v5011_v17, %v5031_v45  ;;  %v9388_v34 = vpack.c.bf16 %v5034_v8, %v5031_v45  ;;  %v5043_v36 = vand.u32 4294901760, %v5015_v0  ;;  %v5561_v45 = vld [vmem:[%s9735_s4] sm:$0xff]  ;;  %v5562_v8 = vld [vmem:[%s9735_s4 + $0x8] sm:$0xff] }
 0x947   :  { %v3698_v23 = vsub.f32 %v3629_v56, %v3697_v59  ;;  %v9393_v39 = vsub.f32 %v5015_v0, %v5043_v36  ;;  %8223 = vmatpush3.bf16.msra.mxu0 %v9388_v34  ;;  %v9402_v53 = vpack.c.bf16 %v5046_v37, %v5043_v36  ;;  %v5117_v56 = vand.u32 4294901760, %v9379_v19 }
 0x948   :  { %8224 = vmatprep.subr.bf16.mxu0 %v9753_v42  ;;  %v8246_v55 = vpack.c.bf16 %v9383_v32, %v9381_v26 }
 0x949   :  { %v3699_v58 = vand.u32 4294901760, %v3698_v23  ;;  %v8252_v2 = vpack.c.bf16 %v9395_v47, %v9393_v39 }
 0x94b   :  { %7628 = vmatmul.mubr.f32.vlgmr.msra.gmra.mrb[6].mxu1 %v2776_v25  ;;  %v3700_v22 = vsub.f32 %v3698_v23, %v3699_v58  ;;  %v5040_v25 = vand.u32 4294901760, %v5014_v9 }
 0x94c   :  { %7661 = vmatpush3.msra.mxu1 %v3632_v51  ;;  %7662 = vmatprep.mubr.msk.f32.mxu1 %vm8729_vm0, %v8730_v1 }
 0x94d   :  { %7665 = vmatprep.subr.mxu1 %v8730_v1  ;;  %v3701_v12 = vand.u32 4294901760, %v3700_v22  ;;  %v9390_v35 = vsub.f32 %v5014_v9, %v5040_v25  ;;  %v9398_v48 = vpack.c.bf16 %v5040_v25, %v5037_v15  ;;  %v5124_v22 = vand.u32 4294901760, %v9381_v26 }
 0x94e   :  { %v5577_v9 = vand.u32 4294901760, %v5561_v45 }
 0x94f   :  { %7663 = vmatmul.mubr.f32.vlgmr.msra.gmra.mrb[8].mxu1 %v3701_v12  ;;  %8226 = vmatpush3.bf16.msra.mxu0 %v9398_v48  ;;  %v5131_v12 = vand.u32 4294901760, %v9383_v32 }
 0x950   :  { %7666 = vmatpush3.msra.mxu1 %v3712_v29  ;;  %7667 = vmatprep.mubr.msk.f32.mxu1 %vm8729_vm0, %v8730_v1  ;;  %v9440_v7 = vsub.f32 %v5561_v45, %v5577_v9 }
 0x951   :  { %7670 = vmatprep.subr.mxu1 %v8730_v1  ;;  %8227 = vmatprep.subr.bf16.mxu0 %v9753_v42  ;;  %v8270_v17 = vpack.c.bf16 %v5131_v12, %v5124_v22 }
 0x953   :  { %8229 = vmatpush3.bf16.msra.mxu0 %v9402_v53 }
 0x954   :  { %8230 = vmatprep.subr.bf16.mxu0 %v9753_v42 }
 0x957   :  { %7668 = vmatmul.mubr.f32.vlgmr.msra.gmra.mrb[8].mxu1 %v3697_v59 }
 0x958   :  { %7671 = vmatpush3.msra.mxu1 %v3709_v54  ;;  %7672 = vmatprep.mubr.msk.f32.mxu1 %vm8729_vm0, %v8730_v1  ;;  %v5110_v54 = vand.u32 4294901760, %v9377_v16 }
 0x959   :  { %7675 = vmatprep.subr.mxu1 %v8730_v1 }
 0x95a   :  { %v8267_v46 = vpack.c.bf16 %v5117_v56, %v5110_v54 }
 0x95f   :  { %7673 = vmatmul.mubr.f32.vlgmr.msra.gmra.mrb[8].mxu1 %v3698_v23  ;;  %v5118_v23 = vsub.f32 %v9379_v19, %v5117_v56 }
 0x960   :  { %7676 = vmatpush3.msra.mxu1 %v3632_v51  ;;  %7677 = vmatprep.mubr.msk.f32.mxu1 %vm8729_vm0, %v8730_v1 }
 0x961   :  { %7680 = vmatprep.subr.mxu1 %v8730_v1  ;;  %v5119_v61 = vand.u32 4294901760, %v5118_v23 }
 0x967   :  { %7678 = vmatmul.mubr.f32.vlgmr.msra.gmra.mrb[8].mxu1 %v3699_v58 }
 0x968   :  { %7681 = vmatpush3.msra.mxu1 %v3710_v20  ;;  %7682 = vmatprep.mubr.msk.f32.mxu1 %vm8729_vm0, %v8730_v1  ;;  %v5111_v20 = vsub.f32 %v9377_v16, %v5110_v54 }
 0x969   :  { %7685 = vmatprep.subr.mxu1 %v8730_v1 }
 0x96a   :  { %v5112_v58 = vand.u32 4294901760, %v5111_v20  ;;  %v5568_v20 = vld [vmem:[%s9735_s4 + $0x38] sm:$0xff] }
 0x96c   :  { %v8231_v29 = vpack.c.bf16 %v5119_v61, %v5112_v58  ;;  %v5598_v58 = vand.u32 4294901760, %v5568_v20  ;;  %v5662_v61 = vand.u32 4294901760, %v9440_v7 }
 0x96f   :  { %7683 = vmatmul.mubr.f32.vlgmr.msra.gmra.mrb[8].mxu1 %v3697_v59 }
 0x970   :  { %7686 = vmatpush3.msra.mxu1 %v3632_v51  ;;  %7687 = vmatprep.mubr.msk.f32.mxu1 %vm8729_vm0, %v8730_v1 }
 0x971   :  { %7720 = vmatprep.subr.mxu1 %v8730_v1 }
 0x977   :  { %7688 = vmatmul.mubr.f32.vlgmr.msra.gmra.mrb[8].mxu1 %v3697_v59 }
 0x978   :  { %7722 = vmatprep.mubr.msk.f32.mxu1 %vm8729_vm0, %v8730_v1 }
 0x9ac   :  { %v4547_v57 = vpop.xlane.xlu1 %4546 }
 0x9ad   :  { %8596 = vrcp.f32 %v4547_v57  ;;  %v5125_v57 = vsub.f32 %v9381_v26, %v5124_v22 }
 0x9b0   :  { %v4551_v49 = vpop.permute.xlu1 %4550 }
 0x9b1   :  { %v4557_v11 = vand.u32 4294901760, %v4551_v49 }
 0x9b3   :  { %7721 = vmatpush3.msra.mxu1 %v4557_v11  ;;  %v4634_v18 = vsub.f32 %v4551_v49, %v4557_v11  ;;  %v5132_v49 = vsub.f32 %v9383_v32, %v5131_v12 }
 0x9b4   :  { %7725 = vmatprep.subr.mxu1 %v8730_v1 }
 0x9b5   :  { %v4635_v21 = vand.u32 4294901760, %v4634_v18 }
 0x9b7   :  { %v8597_v3 = vpop.eup %8596  ;;  %v4636_v63 = vsub.f32 %v4634_v18, %v4635_v21 }
 0x9b8   :  { %v4549_v6 = vmul.f32 %v8597_v3, %v9309_v33  ;;  %v9385_v33 = vsub.f32 %v5013_v43, %v5037_v15  ;;  %v5133_v3 = vand.u32 4294901760, %v5132_v49  ;;  %v5580_v15 = vand.u32 4294901760, %v5562_v8 }
 0x9b9   :  { %v4637_v10 = vand.u32 4294901760, %v4636_v63  ;;  %v5152_v63 = vand.u32 4294901760, %v9393_v39 }
 0x9ba   :  { %v4554_v50 = vsel %vm1773_vm5, %v4549_v6, 0  ;;  %v5138_v6 = vand.u32 4294901760, %v9385_v33  ;;  %v8249_v41 = vpack.c.bf16 %v9390_v35, %v9385_v33  ;;  %v9438_v0 = vpack.c.bf16 %v5580_v15, %v5577_v9 }
 0x9bb   :  { %v4622_v62 = vand.u32 4294901760, %v4554_v50 }
 0x9bd   :  { %v4623_v4 = vsub.f32 %v4554_v50, %v4622_v62 }
 0x9bf   :  { %v4624_v5 = vand.u32 4294901760, %v4623_v4 }
 0x9c1   :  { %v4625_v60 = vsub.f32 %v4623_v4, %v4624_v5 }
 0x9c3   :  { %v4626_v30 = vand.u32 4294901760, %v4625_v60  ;;  %v5159_v60 = vand.u32 4294901760, %v9395_v47 }
 0x9c5   :  { %7723 = vmatmul.mubr.f32.vlgmr.msra.gmra.mrb[10].mxu1 %v4626_v30  ;;  %v8276_v43 = vpack.c.bf16 %v5159_v60, %v5152_v63 }
 0x9c6   :  { %7726 = vmatpush3.msra.mxu1 %v4637_v10  ;;  %7727 = vmatprep.mubr.msk.f32.mxu1 %vm8729_vm0, %v8730_v1  ;;  %v5153_v10 = vsub.f32 %v9393_v39, %v5152_v63 }
 0x9c7   :  { %7730 = vmatprep.subr.mxu1 %v8730_v1 }
 0x9cd   :  { %7728 = vmatmul.mubr.f32.vlgmr.msra.gmra.mrb[10].mxu1 %v4622_v62 }
 0x9ce   :  { %7731 = vmatpush3.msra.mxu1 %v4634_v18  ;;  %7732 = vmatprep.mubr.msk.f32.mxu1 %vm8729_vm0, %v8730_v1  ;;  %v5145_v18 = vand.u32 4294901760, %v9390_v35 }
 0x9cf   :  { %7735 = vmatprep.subr.mxu1 %v8730_v1 }
 0x9d0   :  { %v8273_v40 = vpack.c.bf16 %v5145_v18, %v5138_v6 }
 0x9d5   :  { %7733 = vmatmul.mubr.f32.vlgmr.msra.gmra.mrb[10].mxu1 %v4623_v4 }
 0x9d6   :  { %7736 = vmatpush3.msra.mxu1 %v4557_v11  ;;  %7737 = vmatprep.mubr.msk.f32.mxu1 %vm8729_vm0, %v8730_v1 }
 0x9d7   :  { %7740 = vmatprep.subr.mxu1 %v8730_v1 }
 0x9dd   :  { %7738 = vmatmul.mubr.f32.vlgmr.msra.gmra.mrb[10].mxu1 %v4624_v5 }
 0x9de   :  { %7741 = vmatpush3.msra.mxu1 %v4635_v21  ;;  %7742 = vmatprep.mubr.msk.f32.mxu1 %vm8729_vm0, %v8730_v1  ;;  %v5146_v21 = vsub.f32 %v9390_v35, %v5145_v18  ;;  %v5663_v18 = vsub.f32 %v9440_v7, %v5662_v61 }
 0x9df   :  { %7745 = vmatprep.subr.mxu1 %v8730_v1 }
 0x9e0   :  { %v5147_v5 = vand.u32 4294901760, %v5146_v21 }
 0x9e5   :  { %7743 = vmatmul.mubr.f32.vlgmr.msra.gmra.mrb[10].mxu1 %v4622_v62 }
 0x9e6   :  { %7746 = vmatpush3.msra.mxu1 %v4557_v11  ;;  %7747 = vmatprep.mubr.msk.f32.mxu1 %vm8729_vm0, %v8730_v1  ;;  %v5126_v11 = vand.u32 4294901760, %v5125_v57 }
 0x9e7   :  { %8290 = vmatprep.subr.bf16.mxu1 %v9753_v42 }
 0x9e8   :  { %v8234_v50 = vpack.c.bf16 %v5133_v3, %v5126_v11 }
 0x9ed   :  { %7748 = vmatmul.mubr.f32.vlgmr.msra.gmra.mrb[10].mxu1 %v4622_v62  ;;  %v5139_v62 = vsub.f32 %v9385_v33, %v5138_v6  ;;  %v9527_v6 = vsub.f32 %v5568_v20, %v5598_v58 }
 0x9ee   :  { %7880 = vmatprep.mubr.msk.f32.mxu1 %vm8729_vm0, %v8730_v1  ;;  %8292 = vmatpush3.bf16.msra.mxu1 %v9438_v0 }
 0x9ef   :  { %v5140_v4 = vand.u32 4294901760, %v5139_v62  ;;  %8293 = vmatprep.subr.bf16.mxu1 %v9753_v42  ;;  %v5664_v62 = vand.u32 4294901760, %v5663_v18 }
 0x9f1   :  { %v8237_v30 = vpack.c.bf16 %v5147_v5, %v5140_v4 }
 0xa1e   :  { %v3152_v13 = vpop.f32.mrb[6].mxu1 }
 0xa1f   :  { %3157 = vrot.lane.b32.xlu0 %v3152_v13, %s8736_s24  ;;  %v7629_v27 = vpop.f32.mrb[7].mxu1  ;;  %v5160_v13 = vsub.f32 %v9395_v47, %v5159_v60 }
 0xa20   :  { %v5154_v27 = vand.u32 4294901760, %v5153_v10 }
 0xa4a   :  { %v4073_v28 = vpop.f32.mrb[8].mxu1 }
 0xa4b   :  { %4078 = vrot.lane.b32.xlu1 %v4073_v28, %s8732_s18  ;;  %v7689_v31 = vpop.f32.mrb[9].mxu1  ;;  %v5161_v28 = vand.u32 4294901760, %v5160_v13 }
 0xa4d   :  { %v8240_v31 = vpack.c.bf16 %v5161_v28, %v5154_v27 }
 0xa91   :  { %v3158_v38 = vpop.permute.xlu0 %3157 }
 0xa92   :  { %3161 = vst.msk [vmem:[#allocation2] sm:$0xff] %vm3160_vm6, %v3158_v38  ;;  %v8243_v38 = vpack.c.bf16 %v9379_v19, %v9377_v16  ;;  %v9442_v16 = vsub.f32 %v5562_v8, %v5580_v15 }
 0xa94   :  { %v5669_v22 = vand.u32 4294901760, %v9442_v16 }
 0xabd   :  { %v4079_v51 = vpop.permute.xlu1 %4078 }
 0xabe   :  { %4082 = vst.msk [vmem:[#allocation2] sm:$0xff] %vm4081_vm7, %v4079_v51  ;;  %v5565_v51 = vld [vmem:[%s9735_s4 + $0x20] sm:$0xff] }
 0xac0   :  { %v4998_v52 = vpop.f32.mrb[10].mxu1 }
 0xac1   :  { %5003 = vrot.lane.b32.xlu0 %v4998_v52, %s8737_s25  ;;  %v7749_v59 = vpop.f32.mrb[11].mxu1  ;;  %v5566_v52 = vld [vmem:[%s9735_s4 + $0x28] sm:$0xff] }
 0xac2   :  { %v5592_v54 = vand.u32 4294901760, %v5566_v52  ;;  %v5567_v59 = vld [vmem:[%s9735_s4 + $0x30] sm:$0xff] }
 0xac3   :  { %v5595_v23 = vand.u32 4294901760, %v5567_v59 }
 0xac4   :  { %v9521_v49 = vsub.f32 %v5566_v52, %v5592_v54 }
 0xac5   :  { %v9523_v11 = vpack.c.bf16 %v5598_v58, %v5595_v23  ;;  %v9525_v3 = vsub.f32 %v5567_v59, %v5595_v23 }
 0xac6   :  { %v5697_v28 = vand.u32 4294901760, %v9521_v49 }
 0xb33   :  { %v5004_v19 = vpop.permute.xlu0 %5003 }
 0xb34   :  { %5007 = vst.msk [vmem:[#allocation2] sm:$0xff] %vm5006_vm8, %v5004_v19  ;;  %v8315_v19 = vpack.c.bf16 %v9442_v16, %v9440_v7 }
 0xb3b   :  { %v5008_v25 = vld [vmem:[#allocation2] sm:$0xff] }
 0xb3c   :  { %v5022_v26 = vsel %vm584_vm2, %v5008_v25, 0 }
 0xb3d   :  { %v5097_v32 = vand.u32 4294901760, %v5022_v26 }
 0xb3f   :  { %v5098_v33 = vsub.f32 %v5022_v26, %v5097_v32 }
 0xb41   :  { %v5099_v35 = vand.u32 4294901760, %v5098_v33 }
 0xb43   :  { %v5100_v36 = vsub.f32 %v5098_v33, %v5099_v35 }
 0xb45   :  { %v5101_v37 = vand.u32 4294901760, %v5100_v36 }
 0xb47   :  { %7767 = vmatmul.mubr.f32.vlgmr.msra.gmra.mrb[12].mxu0 %v5101_v37 }
 0xb48   :  { %8232 = vmatpush3.bf16.msra.mxu0 %v8231_v29  ;;  %7785 = vmatprep.mubr.msk.f32.mxu0 %vm8729_vm0, %v8730_v1 }
 0xb49   :  { %8233 = vmatprep.subr.bf16.mxu0 %v9753_v42 }
 0xb4c   :  { %8235 = vmatpush3.bf16.msra.mxu0 %v8234_v50  ;;  %v5670_v50 = vsub.f32 %v9442_v16, %v5669_v22 }
 0xb4d   :  { %8236 = vmatprep.subr.bf16.mxu0 %v9753_v42 }
 0xb4e   :  { %v5671_v5 = vand.u32 4294901760, %v5670_v50 }
 0xb50   :  { %8238 = vmatpush3.bf16.msra.mxu0 %v8237_v30  ;;  %v8303_v30 = vpack.c.bf16 %v5671_v5, %v5664_v62  ;;  %v6174_v62 = vld [vmem:[%s9736_s5 + $0x18] sm:$0xff] }
 0xb51   :  { %8239 = vmatprep.subr.bf16.mxu0 %v9753_v42 }
 0xb54   :  { %8241 = vmatpush3.bf16.msra.mxu0 %v8240_v31 }
 0xb55   :  { %8242 = vmatprep.subr.bf16.mxu0 %v9753_v42 }
 0xb57   :  { %7786 = vmatmul.mubr.f32.vlgmr.msra.gmra.mrb[12].mxu0 %v5097_v32 }
 0xb58   :  { %8244 = vmatpush3.bf16.msra.mxu0 %v8243_v38  ;;  %7804 = vmatprep.mubr.msk.f32.mxu0 %vm8729_vm0, %v8730_v1 }
 0xb59   :  { %8245 = vmatprep.subr.bf16.mxu0 %v9753_v42 }
 0xb5c   :  { %8247 = vmatpush3.bf16.msra.mxu0 %v8246_v55  ;;  %v5698_v55 = vsub.f32 %v9521_v49, %v5697_v28 }
 0xb5d   :  { %8248 = vmatprep.subr.bf16.mxu0 %v9753_v42 }
 0xb60   :  { %8250 = vmatpush3.bf16.msra.mxu0 %v8249_v41 }
 0xb61   :  { %8251 = vmatprep.subr.bf16.mxu0 %v9753_v42 }
 0xb64   :  { %8253 = vmatpush3.bf16.msra.mxu0 %v8252_v2  ;;  %v5699_v2 = vand.u32 4294901760, %v5698_v55 }
 0xb65   :  { %8254 = vmatprep.subr.bf16.mxu0 %v9753_v42 }
 0xb67   :  { %7805 = vmatmul.mubr.f32.vlgmr.msra.gmra.mrb[12].mxu0 %v5098_v33  ;;  %v8339_v33 = vpack.c.bf16 %v5669_v22, %v5662_v61 }
 0xb68   :  { %8256 = vmatpush3.bf16.msra.mxu0 %v9375_v14  ;;  %7823 = vmatprep.mubr.msk.f32.mxu0 %vm8729_vm0, %v8730_v1 }
 0xb69   :  { %8257 = vmatprep.subr.bf16.mxu0 %v9753_v42 }
 0xb6c   :  { %8259 = vmatpush3.bf16.msra.mxu0 %v9388_v34 }
 0xb6d   :  { %8260 = vmatprep.subr.bf16.mxu0 %v9753_v42 }
 0xb70   :  { %8262 = vmatpush3.bf16.msra.mxu0 %v9398_v48 }
 0xb71   :  { %8263 = vmatprep.subr.bf16.mxu0 %v9753_v42 }
 0xb74   :  { %8265 = vmatpush3.bf16.msra.mxu0 %v9402_v53 }
 0xb75   :  { %8266 = vmatprep.subr.bf16.mxu0 %v9753_v42 }
 0xb77   :  { %7824 = vmatmul.mubr.f32.vlgmr.msra.gmra.mrb[12].mxu0 %v5099_v35 }
 0xb78   :  { %8268 = vmatpush3.bf16.msra.mxu0 %v8267_v46  ;;  %7842 = vmatprep.mubr.msk.f32.mxu0 %vm8729_vm0, %v8730_v1  ;;  %v5704_v46 = vand.u32 4294901760, %v9525_v3 }
 0xb79   :  { %8269 = vmatprep.subr.bf16.mxu0 %v9753_v42 }
 0xb7c   :  { %8271 = vmatpush3.bf16.msra.mxu0 %v8270_v17  ;;  %v5711_v17 = vand.u32 4294901760, %v9527_v6 }
 0xb7d   :  { %8272 = vmatprep.subr.bf16.mxu0 %v9753_v42 }
 0xb7e   :  { %v5712_v45 = vsub.f32 %v9527_v6, %v5711_v17  ;;  %v8348_v37 = vpack.c.bf16 %v5711_v17, %v5704_v46 }
 0xb80   :  { %8274 = vmatpush3.bf16.msra.mxu0 %v8273_v40  ;;  %v5713_v9 = vand.u32 4294901760, %v5712_v45 }
 0xb81   :  { %8275 = vmatprep.subr.bf16.mxu0 %v9753_v42 }
 0xb84   :  { %8277 = vmatpush3.bf16.msra.mxu0 %v8276_v43  ;;  %v5705_v43 = vsub.f32 %v9525_v3, %v5704_v46 }
 0xb85   :  { %8278 = vmatprep.subr.bf16.mxu0 %v9753_v42 }
 0xb86   :  { %v5706_v8 = vand.u32 4294901760, %v5705_v43 }
 0xb87   :  { %7843 = vmatmul.mubr.f32.vlgmr.msra.gmra.mrb[12].mxu0 %v5097_v32 }
 0xb88   :  { %8280 = vmatpush3.bf16.msra.mxu0 %v9375_v14  ;;  %7861 = vmatprep.mubr.msk.f32.mxu0 %vm8729_vm0, %v8730_v1  ;;  %v5563_v14 = vld [vmem:[%s9735_s4 + $0x10] sm:$0xff]  ;;  %v8312_v15 = vpack.c.bf16 %v5713_v9, %v5706_v8 }
 0xb89   :  { %8281 = vmatprep.subr.bf16.mxu0 %v9753_v42  ;;  %v5583_v39 = vand.u32 4294901760, %v5563_v14 }
 0xb8b   :  { %v9515_v12 = vsub.f32 %v5563_v14, %v5583_v39  ;;  %v5019_v14 = vsub.s32 5, %v8870_v44 }
 0xb8c   :  { %8283 = vmatpush3.bf16.msra.mxu0 %v9388_v34  ;;  %v5564_v34 = vld [vmem:[%s9735_s4 + $0x18] sm:$0xff] }
 0xb8d   :  { %8284 = vmatprep.subr.bf16.mxu0 %v9753_v42  ;;  %v5586_v47 = vand.u32 4294901760, %v5564_v34  ;;  %v5676_v21 = vand.u32 4294901760, %v9515_v12 }
 0xb8f   :  { %v9517_v29 = vsub.f32 %v5564_v34, %v5586_v47  ;;  %v5677_v63 = vsub.f32 %v9515_v12, %v5676_v21  ;;  %v9557_v34 = vld [vmem:[%s9738_s7] sm:$0xff] }
 0xb90   :  { %8286 = vmatpush3.bf16.msra.mxu0 %v9398_v48  ;;  %v9493_v48 = vpack.c.bf16 %v5586_v47, %v5583_v39  ;;  %v5020_v7 = vrot.slane %v9557_v34, %v5019_v14 }
 0xb91   :  { %8287 = vmatprep.subr.bf16.mxu0 %v9753_v42  ;;  %v5683_v4 = vand.u32 4294901760, %v9517_v29  ;;  %v5678_v10 = vand.u32 4294901760, %v5677_v63  ;;  %v8318_v25 = vpack.c.bf16 %v9517_v29, %v9515_v12 }
 0xb92   :  { %8295 = vmatpush3.bf16.msra.mxu1 %v9493_v48 }
 0xb93   :  { %8296 = vmatprep.subr.bf16.mxu1 %v9753_v42  ;;  %v5684_v60 = vsub.f32 %v9517_v29, %v5683_v4  ;;  %v8342_v35 = vpack.c.bf16 %v5683_v4, %v5676_v21  ;;  %v6192_v4 = vand.u32 4294901760, %v6174_v62 }
 0xb94   :  { %8289 = vmatpush3.bf16.msra.mxu0 %v9402_v53  ;;  %v5589_v53 = vand.u32 4294901760, %v5565_v51 }
 0xb95   :  { %8362 = vmatprep.subr.bf16.mxu0 %v9753_v42  ;;  %v5685_v13 = vand.u32 4294901760, %v5684_v60 }
 0xb96   :  { %v9503_v56 = vpack.c.bf16 %v5592_v54, %v5589_v53  ;;  %v9519_v57 = vsub.f32 %v5565_v51, %v5589_v53 }
 0xb97   :  { %7862 = vmatmul.mubr.f32.vlgmr.msra.gmra.mrb[12].mxu0 %v5097_v32  ;;  %v8306_v31 = vpack.c.bf16 %v5685_v13, %v5678_v10  ;;  %v8324_v32 = vpack.c.bf16 %v9527_v6, %v9525_v3  ;;  %v6172_v3 = vld [vmem:[%s9736_s5 + $0x8] sm:$0xff]  ;;  %v6173_v6 = vld [vmem:[%s9736_s5 + $0x10] sm:$0xff]  ;;  %v9627_v10 = vsub.f32 %v6174_v62, %v6192_v4 }
 0xb98   :  { %7986 = vmatprep.mubr.msk.f32.mxu0 %vm8729_vm0, %v8730_v1  ;;  %8298 = vmatpush3.bf16.msra.mxu1 %v9503_v56  ;;  %v5690_v27 = vand.u32 4294901760, %v9519_v57  ;;  %v8321_v26 = vpack.c.bf16 %v9521_v49, %v9519_v57  ;;  %v6186_v50 = vand.u32 4294901760, %v6172_v3  ;;  %v6189_v21 = vand.u32 4294901760, %v6173_v6 }
 0xb99   :  { %8299 = vmatprep.subr.bf16.mxu1 %v9753_v42  ;;  %v6285_v46 = vand.u32 4294901760, %v9627_v10 }
 0xb9a   :  { %v5691_v38 = vsub.f32 %v9519_v57, %v5690_v27  ;;  %v8345_v36 = vpack.c.bf16 %v5697_v28, %v5690_v27  ;;  %v9623_v60 = vsub.f32 %v6172_v3, %v6186_v50  ;;  %v9630_v13 = vpack.c.bf16 %v6192_v4, %v6189_v21 }
 0xb9b   :  { %v6286_v43 = vsub.f32 %v9627_v10, %v6285_v46 }
 0xb9c   :  { %8301 = vmatpush3.bf16.msra.mxu1 %v9523_v11  ;;  %v5692_v41 = vand.u32 4294901760, %v5691_v38  ;;  %v6271_v28 = vand.u32 4294901760, %v9623_v60 }
 0xb9d   :  { %8302 = vmatprep.subr.bf16.mxu1 %v9753_v42  ;;  %v6287_v8 = vand.u32 4294901760, %v6286_v43 }
 0xb9e   :  { %v8309_v40 = vpack.c.bf16 %v5699_v2, %v5692_v41  ;;  %v6272_v38 = vsub.f32 %v9623_v60, %v6271_v28 }
 0xba0   :  { %v6273_v41 = vand.u32 4294901760, %v6272_v38 }
 0xc6a   :  { %v5557_v16 = vpop.f32.mrb[12].mxu0 }
 0xc6b   :  { %v8421_v39 = vadd.f32 %v5557_v16, %v5020_v7  ;;  %v7863_v47 = vpop.f32.mrb[13].mxu0  ;;  %v9656_v16 = vld [vmem:[%s9738_s7 + $0x10] sm:$0x3f]  ;;  %s8738_s7 = smov [#allocation11]  }
 0xc6c   :  { %s7151_s26 = sshll.u32 %s8738_s7, 4  ;;  %s7152_s26 = int_to_ptr.vmem [resolvable:$true] %s7151_s26 }
 0xc6d   :  { %v5574_v51 = vsel %vm584_vm2, %v8421_v39, 0  ;;  %v9754_v39 = vsub.s32 0, %v8870_v44  ;;  %s8692_s27 = scalar_lea.vmem %s7152_s26, 128  ;;  %p8697_p5 = scmp.lt.s32.totalorder %s7152_s26, %s7152_s26 }
 0xc6e   :  { %v5649_v52 = vand.u32 4294901760, %v5574_v51  ;;  %p8693_p4 = scmp.ne.s32.totalorder %s7152_s26, %s8692_s27  ;;  %p8698_p6 = scmp.lt.s32.totalorder %s8692_s27, %s8692_s27 }
 0xc6f   :  { %v6135_v47 = vrot.slane %v9656_v16, %v9754_v39 }
 0xc70   :  { %v5650_v53 = vsub.f32 %v5574_v51, %v5649_v52  ;;  %p8699_p7 = por %p8698_p6, %p8697_p5 }
 0xc72   :  { %v5651_v54 = vand.u32 4294901760, %v5650_v53  ;;  %p8700_p8 = pnand %p8699_p7, %p8693_p4 }
 0xc74   :  { %v5652_v59 = vsub.f32 %v5650_v53, %v5651_v54 }
 0xc76   :  { %v5653_v20 = vand.u32 4294901760, %v5652_v59 }
 0xc78   :  { %7881 = vmatmul.mubr.f32.vlgmr.msra.gmra.mrb[12].mxu1 %v5653_v20 }
 0xc79   :  { %8304 = vmatpush3.bf16.msra.mxu1 %v8303_v30  ;;  %7899 = vmatprep.mubr.msk.f32.mxu1 %vm8729_vm0, %v8730_v1  ;;  %v9625_v30 = vsub.f32 %v6173_v6, %v6189_v21 }
 0xc7a   :  { %8305 = vmatprep.subr.bf16.mxu1 %v9753_v42 }
 0xc7b   :  { %v6278_v2 = vand.u32 4294901760, %v9625_v30 }
 0xc7d   :  { %8307 = vmatpush3.bf16.msra.mxu1 %v8306_v31 }
 0xc7e   :  { %8308 = vmatprep.subr.bf16.mxu1 %v9753_v42 }
 0xc81   :  { %8310 = vmatpush3.bf16.msra.mxu1 %v8309_v40  ;;  %v6279_v40 = vsub.f32 %v9625_v30, %v6278_v2 }
 0xc82   :  { %8311 = vmatprep.subr.bf16.mxu1 %v9753_v42 }
 0xc83   :  { %v6280_v45 = vand.u32 4294901760, %v6279_v40  ;;  %v6671_v40 = vld [vmem:[#allocation9 + $0x8] sm:$0xff] }
 0xc85   :  { %8313 = vmatpush3.bf16.msra.mxu1 %v8312_v15  ;;  %v8372_v9 = vpack.c.bf16 %v6287_v8, %v6280_v45  ;;  %v6683_v45 = vand.u32 4294901760, %v6671_v40 }
 0xc86   :  { %8314 = vmatprep.subr.bf16.mxu1 %v9753_v42 }
 0xc88   :  { %7900 = vmatmul.mubr.f32.vlgmr.msra.gmra.mrb[12].mxu1 %v5649_v52 }
 0xc89   :  { %8316 = vmatpush3.bf16.msra.mxu1 %v8315_v19  ;;  %7918 = vmatprep.mubr.msk.f32.mxu1 %vm8729_vm0, %v8730_v1  ;;  %v8378_v19 = vpack.c.bf16 %v9627_v10, %v9625_v30 }
 0xc8a   :  { %8317 = vmatprep.subr.bf16.mxu1 %v9753_v42 }
 0xc8d   :  { %8319 = vmatpush3.bf16.msra.mxu1 %v8318_v25 }
 0xc8e   :  { %8320 = vmatprep.subr.bf16.mxu1 %v9753_v42 }
 0xc91   :  { %8322 = vmatpush3.bf16.msra.mxu1 %v8321_v26  ;;  %v9649_v26 = vpack.c.bf16 %v6285_v46, %v6278_v2 }
 0xc92   :  { %8323 = vmatprep.subr.bf16.mxu1 %v9753_v42 }
 0xc95   :  { %8325 = vmatpush3.bf16.msra.mxu1 %v8324_v32 }
 0xc96   :  { %8326 = vmatprep.subr.bf16.mxu1 %v9753_v42 }
 0xc98   :  { %7919 = vmatmul.mubr.f32.vlgmr.msra.gmra.mrb[12].mxu1 %v5650_v53 }
 0xc99   :  { %8328 = vmatpush3.bf16.msra.mxu1 %v9438_v0  ;;  %7937 = vmatprep.mubr.msk.f32.mxu1 %vm8729_vm0, %v8730_v1 }
 0xc9a   :  { %8329 = vmatprep.subr.bf16.mxu1 %v9753_v42 }
 0xc9d   :  { %8331 = vmatpush3.bf16.msra.mxu1 %v9493_v48 }
 0xc9e   :  { %8332 = vmatprep.subr.bf16.mxu1 %v9753_v42 }
 0xca1   :  { %8334 = vmatpush3.bf16.msra.mxu1 %v9503_v56 }
 0xca2   :  { %8335 = vmatprep.subr.bf16.mxu1 %v9753_v42 }
 0xca5   :  { %8337 = vmatpush3.bf16.msra.mxu1 %v9523_v11 }
 0xca6   :  { %8338 = vmatprep.subr.bf16.mxu1 %v9753_v42 }
 0xca8   :  { %7938 = vmatmul.mubr.f32.vlgmr.msra.gmra.mrb[12].mxu1 %v5651_v54 }
 0xca9   :  { %8340 = vmatpush3.bf16.msra.mxu1 %v8339_v33  ;;  %7956 = vmatprep.mubr.msk.f32.mxu1 %vm8729_vm0, %v8730_v1 }
 0xcaa   :  { %8341 = vmatprep.subr.bf16.mxu1 %v9753_v42 }
 0xcad   :  { %8343 = vmatpush3.bf16.msra.mxu1 %v8342_v35 }
 0xcae   :  { %8344 = vmatprep.subr.bf16.mxu1 %v9753_v42 }
 0xcb1   :  { %8346 = vmatpush3.bf16.msra.mxu1 %v8345_v36  ;;  %v6129_v36 = vsub.s32 7, %v8870_v44 }
 0xcb2   :  { %8347 = vmatprep.subr.bf16.mxu1 %v9753_v42 }
 0xcb5   :  { %8349 = vmatpush3.bf16.msra.mxu1 %v8348_v37  ;;  %v6130_v37 = vrot.slane %v9557_v34, %v6129_v36 }
 0xcb6   :  { %8350 = vmatprep.subr.bf16.mxu1 %v9753_v42 }
 0xcb8   :  { %7957 = vmatmul.mubr.f32.vlgmr.msra.gmra.mrb[12].mxu1 %v5649_v52 }
 0xcb9   :  { %8352 = vmatpush3.bf16.msra.mxu1 %v9438_v0  ;;  %7975 = vmatprep.mubr.msk.f32.mxu1 %vm8729_vm0, %v8730_v1  ;;  %v5571_v0 = vsub.s32 6, %v8870_v44 }
 0xcba   :  { %8353 = vmatprep.subr.bf16.mxu1 %v9753_v42 }
 0xcbb   :  { %v5572_v23 = vrot.slane %v9557_v34, %v5571_v0 }
 0xcbd   :  { %8355 = vmatpush3.bf16.msra.mxu1 %v9493_v48 }
 0xcbe   :  { %8356 = vmatprep.subr.bf16.mxu1 %v9753_v42 }
 0xcc1   :  { %8358 = vmatpush3.bf16.msra.mxu1 %v9503_v56 }
 0xcc2   :  { %8359 = vmatprep.subr.bf16.mxu1 %v9753_v42 }
 0xcc5   :  { %8361 = vmatpush3.bf16.msra.mxu1 %v9523_v11  ;;  %v6171_v11 = vld [vmem:[%s9736_s5] sm:$0xff] }
 0xcc6   :  { %8398 = vmatprep.subr.bf16.mxu1 %v9753_v42  ;;  %v6183_v18 = vand.u32 4294901760, %v6171_v11 }
 0xcc8   :  { %7976 = vmatmul.mubr.f32.vlgmr.msra.gmra.mrb[12].mxu1 %v5649_v52  ;;  %v9619_v5 = vpack.c.bf16 %v6186_v50, %v6183_v18  ;;  %v9621_v63 = vsub.f32 %v6171_v11, %v6183_v18  ;;  %v9755_v50 = vsub.s32 1, %v8870_v44 }
 0xcc9   :  { %8048 = vmatprep.mubr.msk.f32.mxu1 %vm8729_vm0, %v8730_v1 }
 0xcca   :  { %8364 = vmatpush3.bf16.msra.mxu0 %v9619_v5  ;;  %v6264_v27 = vand.u32 4294901760, %v9621_v63  ;;  %v8375_v15 = vpack.c.bf16 %v9623_v60, %v9621_v63  ;;  %v6161_v62 = vrot.slane %v9656_v16, %v9755_v50 }
 0xccb   :  { %8365 = vmatprep.subr.bf16.mxu0 %v9753_v42 }
 0xccc   :  { %v6265_v31 = vsub.f32 %v9621_v63, %v6264_v27  ;;  %v9647_v25 = vpack.c.bf16 %v6271_v28, %v6264_v27  ;;  %v9756_v63 = vsub.s32 2, %v8870_v44 }
 0xcce   :  { %8367 = vmatpush3.bf16.msra.mxu0 %v9630_v13  ;;  %v6266_v55 = vand.u32 4294901760, %v6265_v31  ;;  %v6166_v60 = vrot.slane %v9656_v16, %v9756_v63 }
 0xccf   :  { %8368 = vmatprep.subr.bf16.mxu0 %v9753_v42 }
 0xcd0   :  { %v8369_v17 = vpack.c.bf16 %v6273_v41, %v6266_v55 }
 0xd9b   :  { %v6109_v58 = vpop.f32.mrb[12].mxu1 }
 0xd9c   :  { %v8422_v48 = vadd.f32 %v6109_v58, %v5572_v23  ;;  %v7977_v61 = vpop.f32.mrb[13].mxu1 }
 0xd9e   :  { %v6113_v22 = vsel %vm95_vm1, %v8422_v48, 0.0 }
 0xd9f   :  { %6114 = vadd.xlane.f32.xlu1 %v6113_v22 }
 0xe2c   :  { %v6115_v56 = vpop.xlane.xlu1 %6114 }
 0xe2d   :  { %v6117_v12 = vmul.f32 0.03125, %v6115_v56 }
 0xe2f   :  { %v6118_v29 = vsub.f32 %v8422_v48, %v6117_v12 }
 0xe31   :  { %v6119_v57 = vmul.f32 %v6118_v29, %v6118_v29 }
 0xe33   :  { %v6120_v49 = vsel %vm95_vm1, %v6119_v57, 0.0 }
 0xe34   :  { %6121 = vadd.xlane.f32.xlu0 %v6120_v49 }
 0xec1   :  { %v6122_v32 = vpop.xlane.xlu0 %6121 }
 0xec2   :  { %v6123_v33 = vmul.f32 0.03125, %v6122_v32 }
 0xec4   :  { %v6124_v35 = vadd.f32 0.0001, %v6123_v33 }
 0xec6   :  { %8598 = vrsqrt.f32 %v6124_v35 }
 0xed0   :  { %v8599_v7 = vpop.eup %8598 }
 0xed1   :  { %v6126_v51 = vmul.f32 %v8599_v7, %v6118_v29 }
 0xed3   :  { %v6131_v52 = vmul.f32 %v6130_v37, %v6126_v51  ;;  %v6178_v37 = vrot.slane %v9656_v16, %v638_v24  ;;  %v6675_v24 = vrot.slane %v9656_v16, %v5019_v14 }
 0xed5   :  { %v6136_v53 = vadd.f32 %v6135_v47, %v6131_v52 }
 0xed7   :  { %v6137_v54 = vsel %vm95_vm1, %v6136_v53, 0.0 }
 0xed8   :  { %v6138_v59 = vrot.slane %v6137_v54, 4 }
 0xeda   :  { %v6139_v20 = vadd.f32 %v6138_v59, %v6137_v54 }
 0xedc   :  { %v6140_v0 = vrot.slane %v6139_v20, 2 }
 0xede   :  { %v6141_v23 = vadd.f32 %v6140_v0, %v6139_v20 }
 0xee0   :  { %v6142_v34 = vrot.slane %v6141_v23, 1 }
 0xee2   :  { %v6143_v58 = vadd.f32 %v6142_v34, %v6141_v23 }
 0xee4   :  { %v6144_v48 = vmul.f32 0.125, %v6143_v58 }
 0xee6   :  { %v6145_v61 = vsub.f32 %v6136_v53, %v6144_v48 }
 0xee8   :  { %v6146_v22 = vmul.f32 %v6145_v61, %v6145_v61 }
 0xeea   :  { %v6147_v56 = vsel %vm95_vm1, %v6146_v22, 0.0 }
 0xeeb   :  { %v6148_v12 = vrot.slane %v6147_v56, 4 }
 0xeed   :  { %v6149_v57 = vadd.f32 %v6148_v12, %v6147_v56 }
 0xeef   :  { %v6150_v49 = vrot.slane %v6149_v57, 2 }
 0xef1   :  { %v6151_v11 = vadd.f32 %v6150_v49, %v6149_v57 }
 0xef3   :  { %v6152_v29 = vrot.slane %v6151_v11, 1 }
 0xef5   :  { %v6153_v3 = vadd.f32 %v6152_v29, %v6151_v11 }
 0xef7   :  { %v6154_v6 = vmul.f32 0.125, %v6153_v3 }
 0xef9   :  { %v6155_v18 = vadd.f32 0.0001, %v6154_v6 }
 0xefb   :  { %8600 = vrsqrt.f32 %v6155_v18 }
 0xf05   :  { %v8601_v21 = vpop.eup %8600 }
 0xf06   :  { %v6157_v4 = vmul.f32 %v8601_v21, %v6145_v61 }
 0xf08   :  { %v6162_v30 = vmul.f32 %v6161_v62, %v6157_v4 }
 0xf0a   :  { %v6167_v10 = vadd.f32 %v6166_v60, %v6162_v30 }
 0xf0c   :  { %vm6168_vm9 = vcmp.ge.f32.partialorder %v6167_v10, 0.0  ;;  %v6169_v27 = vmul.f32 0.01, %v6167_v10 }
 0xf0e   :  { %v6170_v28 = vsel %vm6168_vm9, %v6167_v10, %v6169_v27 }
 0xf0f   :  { %v6180_v31 = vsel %vm95_vm1, %v6170_v28, 0 }
 0xf10   :  { %v6251_v38 = vand.u32 4294901760, %v6180_v31 }
 0xf12   :  { %v6252_v55 = vsub.f32 %v6180_v31, %v6251_v38 }
 0xf14   :  { %v6253_v41 = vand.u32 4294901760, %v6252_v55 }
 0xf16   :  { %v6254_v2 = vsub.f32 %v6252_v55, %v6253_v41 }
 0xf18   :  { %v6255_v46 = vand.u32 4294901760, %v6254_v2 }
 0xf1a   :  { %7987 = vmatmul.mubr.f32.vlgmr.msra.gmra.mrb[14].mxu0 %v6255_v46 }
 0xf1b   :  { %8370 = vmatpush3.bf16.msra.mxu0 %v8369_v17  ;;  %7997 = vmatprep.mubr.msk.f32.mxu0 %vm8729_vm0, %v8730_v1  ;;  %v6670_v17 = vld [vmem:[#allocation9] sm:$0xff] }
 0xf1c   :  { %8371 = vmatprep.subr.bf16.mxu0 %v9753_v42  ;;  %v6680_v43 = vand.u32 4294901760, %v6670_v17 }
 0xf1e   :  { %v8399_v8 = vpack.c.bf16 %v6683_v45, %v6680_v43 }
 0xf1f   :  { %8373 = vmatpush3.bf16.msra.mxu0 %v8372_v9  ;;  %v6758_v9 = vsub.f32 %v6670_v17, %v6680_v43 }
 0xf20   :  { %8374 = vmatprep.subr.bf16.mxu0 %v9753_v42  ;;  %8400 = vmatpush3.bf16.msra.mxu1 %v8399_v8 }
 0xf21   :  { %8401 = vmatprep.subr.bf16.mxu1 %v9753_v42 }
 0xf22   :  { %7998 = vmatmul.mubr.f32.vlgmr.msra.gmra.mrb[14].mxu0 %v6251_v38 }
 0xf23   :  { %8376 = vmatpush3.bf16.msra.mxu0 %v8375_v15  ;;  %8008 = vmatprep.mubr.msk.f32.mxu0 %vm8729_vm0, %v8730_v1  ;;  %v6765_v15 = vsub.f32 %v6671_v40, %v6683_v45 }
 0xf24   :  { %8377 = vmatprep.subr.bf16.mxu0 %v9753_v42 }
 0xf25   :  { %v8405_v36 = vpack.c.bf16 %v6765_v15, %v6758_v9 }
 0xf27   :  { %8379 = vmatpush3.bf16.msra.mxu0 %v8378_v19  ;;  %v6759_v19 = vand.u32 4294901760, %v6758_v9 }
 0xf28   :  { %8380 = vmatprep.subr.bf16.mxu0 %v9753_v42 }
 0xf2a   :  { %8009 = vmatmul.mubr.f32.vlgmr.msra.gmra.mrb[14].mxu0 %v6252_v55 }
 0xf2b   :  { %8382 = vmatpush3.bf16.msra.mxu0 %v9619_v5  ;;  %8019 = vmatprep.mubr.msk.f32.mxu0 %vm8729_vm0, %v8730_v1 }
 0xf2c   :  { %8383 = vmatprep.subr.bf16.mxu0 %v9753_v42 }
 0xf2f   :  { %8385 = vmatpush3.bf16.msra.mxu0 %v9630_v13 }
 0xf30   :  { %8386 = vmatprep.subr.bf16.mxu0 %v9753_v42 }
 0xf32   :  { %8020 = vmatmul.mubr.f32.vlgmr.msra.gmra.mrb[14].mxu0 %v6253_v41 }
 0xf33   :  { %8388 = vmatpush3.bf16.msra.mxu0 %v9647_v25  ;;  %8030 = vmatprep.mubr.msk.f32.mxu0 %vm8729_vm0, %v8730_v1  ;;  %v6766_v25 = vand.u32 4294901760, %v6765_v15 }
 0xf34   :  { %8389 = vmatprep.subr.bf16.mxu0 %v9753_v42 }
 0xf37   :  { %8391 = vmatpush3.bf16.msra.mxu0 %v9649_v26  ;;  %v6767_v26 = vsub.f32 %v6765_v15, %v6766_v25 }
 0xf38   :  { %8392 = vmatprep.subr.bf16.mxu0 %v9753_v42 }
 0xf39   :  { %v6768_v33 = vand.u32 4294901760, %v6767_v26 }
 0xf3a   :  { %8031 = vmatmul.mubr.f32.vlgmr.msra.gmra.mrb[14].mxu0 %v6251_v38 }
 0xf3b   :  { %8394 = vmatpush3.bf16.msra.mxu0 %v9619_v5  ;;  %8041 = vmatprep.mubr.msk.f32.mxu0 %vm8729_vm0, %v8730_v1  ;;  %v6760_v5 = vsub.f32 %v6758_v9, %v6759_v19 }
 0xf3c   :  { %8395 = vmatprep.subr.bf16.mxu0 %v9753_v42 }
 0xf3d   :  { %v6761_v32 = vand.u32 4294901760, %v6760_v5 }
 0xf3f   :  { %8397 = vmatpush3.bf16.msra.mxu0 %v9630_v13  ;;  %v8402_v35 = vpack.c.bf16 %v6768_v33, %v6761_v32  ;;  %v8411_v13 = vpack.c.bf16 %v6766_v25, %v6759_v19 }
 0xf42   :  { %8042 = vmatmul.mubr.f32.vlgmr.msra.gmra.mrb[14].mxu0 %v6251_v38 }
0x1015   :  { %v6663_v7 = vpop.f32.mrb[14].mxu0 }
0x1016   :  { %v8423_v39 = vadd.f32 %v6663_v7, %v6178_v37  ;;  %v8043_v47 = vpop.f32.mrb[15].mxu0 }
0x1018   :  { %vm6667_vm10 = vcmp.ge.f32.partialorder %v8423_v39, 0.0  ;;  %v6668_v51 = vmul.f32 0.01, %v8423_v39 }
0x101a   :  { %v6669_v52 = vsel %vm6667_vm10, %v8423_v39, %v6668_v51 }
0x101b   :  { %v6677_v53 = vsel %vm1321_vm4, %v6669_v52, 0  ;;  %7138 = vst.msk [vmem:[#allocation11] sm:$0xff] %vm1321_vm4, %v6669_v52 }
0x101c   :  { %v6746_v54 = vand.u32 4294901760, %v6677_v53 }
0x101e   :  { %v6747_v59 = vsub.f32 %v6677_v53, %v6746_v54 }
0x1020   :  { %v6748_v20 = vand.u32 4294901760, %v6747_v59 }
0x1022   :  { %v6749_v0 = vsub.f32 %v6747_v59, %v6748_v20 }
0x1024   :  { %v6750_v23 = vand.u32 4294901760, %v6749_v0 }
0x1026   :  { %8049 = vmatmul.mubr.f32.vlgmr.msra.gmra.mrb[14].mxu1 %v6750_v23 }
0x1027   :  { %8403 = vmatpush3.bf16.msra.mxu1 %v8402_v35  ;;  %8055 = vmatprep.mubr.msk.f32.mxu1 %vm8729_vm0, %v8730_v1 }
0x1028   :  { %8404 = vmatprep.subr.bf16.mxu1 %v9753_v42 }
0x102e   :  { %8056 = vmatmul.mubr.f32.vlgmr.msra.gmra.mrb[14].mxu1 %v6746_v54 }
0x102f   :  { %8406 = vmatpush3.bf16.msra.mxu1 %v8405_v36  ;;  %8062 = vmatprep.mubr.msk.f32.mxu1 %vm8729_vm0, %v8730_v1 }
0x1030   :  { %8407 = vmatprep.subr.bf16.mxu1 %v9753_v42 }
0x1036   :  { %8063 = vmatmul.mubr.f32.vlgmr.msra.gmra.mrb[14].mxu1 %v6747_v59 }
0x1037   :  { %8409 = vmatpush3.bf16.msra.mxu1 %v8399_v8  ;;  %8069 = vmatprep.mubr.msk.f32.mxu1 %vm8729_vm0, %v8730_v1 }
0x1038   :  { %8410 = vmatprep.subr.bf16.mxu1 %v9753_v42 }
0x103e   :  { %8070 = vmatmul.mubr.f32.vlgmr.msra.gmra.mrb[14].mxu1 %v6748_v20 }
0x103f   :  { %8412 = vmatpush3.bf16.msra.mxu1 %v8411_v13  ;;  %8076 = vmatprep.mubr.msk.f32.mxu1 %vm8729_vm0, %v8730_v1 }
0x1040   :  { %8413 = vmatprep.subr.bf16.mxu1 %v9753_v42 }
0x1046   :  { %8077 = vmatmul.mubr.f32.vlgmr.msra.gmra.mrb[14].mxu1 %v6746_v54 }
0x1047   :  { %8415 = vmatpush3.bf16.msra.mxu1 %v8399_v8  ;;  %8083 = vmatprep.mubr.msk.f32.mxu1 %vm8729_vm0, %v8730_v1 }
0x104e   :  { %8084 = vmatmul.mubr.f32.vlgmr.msra.gmra.mrb[14].mxu1 %v6746_v54 }
0x1121   :  { %v7134_v34 = vpop.f32.mrb[14].mxu1 }
0x1122   :  { %v8424_v58 = vadd.f32 %v7134_v34, %v6675_v24  ;;  %v8085_v48 = vpop.f32.mrb[15].mxu1 }
0x1124   :  { %7140 = vrot.lane.b32.xlu0 %v8424_v58, %s8736_s24 }
0x1196   :  { %v7141_v42 = vpop.permute.xlu0 %7140 }
0x1197   :  { %7144 = vst.msk [vmem:[#allocation11] sm:$0xff] %vm7143_vm11, %v7141_v42 }
0x1198   :  { %8703 = shalt.err (!%p8700_p8)
}
0x1199   :  { %s8704_s1 = scalar_lea.hbm %s9739_s8, 128 }
0x119a   :  { %p8705_p9 = scmp.ne.s32.totalorder %s9739_s8, %s8704_s1  ;;  %p8708_p10 = scmp.lt.u32.totalorder %s8704_s1, %s9739_s8 }
0x119c   :  { %p8710_p11 = pnand %p8708_p10, %p8705_p9 }
0x119e   :  { %8713 = shalt.err (!%p8710_p11)
}
0x119f   :  { %7154 = dma.vmem_to_hbm [thread:$0]  %s7152_s26, 128, %s9739_s8, [#allocation5]  }
0x11a0   :  { %8720 = dma.done.wait [#allocation5], 128  }
0x11a1   :  { %8721 = vsyncadd [#allocation5], 4294967168 }
0x11a2   :  { %7158 = vsyncpa [#allocation4], 1 }
0x11a3   :  { %7159 = vsyncpa [#allocation7], 1 }
0x11a4   :  { %7160 = vsyncpa [#allocation10], 1 }
0x11a5   :  { %7161 = vsyncpa [#allocation5], 1 }

</bundles_post_ra>
